<compile_context>
chip_gen: v7x
topology: tpu7x:2x2x1
jax: 0.10.0
libtpu: 0.0.40
codegen_flags: <defaults>
</compile_context>

<pallas_src>
import math
from functools import partial

import jax
import jax.numpy as jnp
from jax.experimental import pallas as pl
from jax.experimental.pallas import tpu as pltpu

# Operand dtype fed to the MXU.  float32 keeps exact parity with the PyTorch
# reference at this size; switch to jnp.bfloat16 on v6e/v7x at real sizes for
# ~2x MXU throughput (accumulation stays f32 either way, VPU/EUP math stays f32).
MXU_DTYPE = jnp.float32

_LN_EPS = 1e-5


# ------------------------- in-kernel helper functions -----------------------

def _mm(a, b):
    """MXU matmul with f32 accumulation."""
    return jnp.dot(a.astype(MXU_DTYPE), b.astype(MXU_DTYPE),
                   preferred_element_type=jnp.float32)


def _mm_t(a, b):
    """a @ b.T with f32 accumulation."""
    return jnp.dot(a.astype(MXU_DTYPE), b.astype(MXU_DTYPE).T,
                   preferred_element_type=jnp.float32)


def _layernorm(x, gamma):
    """LayerNorm(bias=False), eps=1e-5, over the last dim (f32 VPU math)."""
    mean = jnp.mean(x, axis=-1, keepdims=True)
    var = jnp.mean(jnp.square(x - mean), axis=-1, keepdims=True)
    return (x - mean) * jax.lax.rsqrt(var + _LN_EPS) * gamma


def _full_spec(arr):
    """Whole-array block spec (weights/tables are tiny; re-fetched per step)."""
    ndim = arr.ndim
    return pl.BlockSpec(arr.shape, lambda *_: (0,) * ndim)


# ----------------------------- fused Pallas kernels --------------------------

def _attn_block_kernel(x_ref, g_ref, w1_ref, w2_ref, w3_ref, wo_ref,
                       cos_ref, sin_ref, rot_ref, o_ref,
                       *, num_heads, head_dim, rotary_dim, latent_dim, scale):
    """out = x + o_proj(MLA(LN_1(x))) for one batch's T tokens."""
    nh, hd, rd, L = num_heads, head_dim, rotary_dim, latent_dim
    x = x_ref[...].astype(jnp.float32)                       # (T, H)
    h = _layernorm(x, g_ref[...].astype(jnp.float32))

    # Merged down-projections: [kv_latent | q_latent | k_rope] in one matmul.
    lat = _mm(h, w1_ref[...])                                # (T, 2L + nh*rd)
    kv_lat = lat[:, :L]
    q_lat = lat[:, L:2 * L]
    k_rope = lat[:, 2 * L:]                                  # (T, nh*rd)

    # Merged up-projections: [k | v] from kv_latent, [q | q_rope] from q_latent.
    kv_up = _mm(kv_lat, w2_ref[...])                         # (T, 2*nh*hd)
    q_up = _mm(q_lat, w3_ref[...])                           # (T, nh*hd + nh*rd)
    k_flat = kv_up[:, :nh * hd]
    v_flat = kv_up[:, nh * hd:]
    q_flat = q_up[:, :nh * hd]
    q_rope = q_up[:, nh * hd:]                               # (T, nh*rd)

    # Decoupled RoPE for all heads at once; rotate_half is a constant matmul
    # (block-diagonal [[0, I], [-I, 0]]), so no lane-axis concat is needed.
    cos = cos_ref[...]
    sin = sin_ref[...]
    rot = rot_ref[...]
    q_rope = q_rope * cos + _mm(q_rope, rot) * sin
    k_rope = k_rope * cos + _mm(k_rope, rot) * sin

    t = x.shape[0]
    row = jax.lax.broadcasted_iota(jnp.int32, (t, t), 0)
    col = jax.lax.broadcasted_iota(jnp.int32, (t, t), 1)
    causal = col <= row

    wo = wo_ref[...]                                         # (H, H)
    attn_out = jnp.zeros_like(x)                             # (T, H)
    for head in range(nh):
        r0, r1 = head * rd, (head + 1) * rd                  # rope slice
        n0, n1 = head * hd + rd, (head + 1) * hd             # non-rotary slice
        v0, v1 = head * hd, (head + 1) * hd
        # score = rope part + non-rotary part (== concat([rope, nope]) dot).
        s = (_mm_t(q_rope[:, r0:r1] * scale, k_rope[:, r0:r1]) +
             _mm_t(q_flat[:, n0:n1] * scale, k_flat[:, n0:n1]))
        s = jnp.where(causal, s, -jnp.inf)
        m = jnp.max(s, axis=-1, keepdims=True)
        p = jnp.exp(s - m)
        l = jnp.sum(p, axis=-1, keepdims=True)
        p = p * pl.reciprocal(l, approx=True)                # EUP divide
        y_h = _mm(p, v_flat[:, v0:v1])                       # (T, hd)
        # o_proj folded per head: y @ Wo == sum_h y_h @ Wo[h*hd:(h+1)*hd, :]
        attn_out = attn_out + _mm(y_h, wo[v0:v1, :])
    o_ref[...] = (x + attn_out).astype(o_ref.dtype)


def attention_block(x, blk, cfg, cos, sin, rot, batch, seq):
    """x: (B*T, H) -> (B*T, H). Fused LN1 + MLA + residual, grid over batch."""
    bt, hidden = x.shape
    nh, hd, rd = cfg.num_attention_heads, cfg.head_dim, cfg.rotary_dim
    latent = hidden // cfg.compression_ratio
    kern = partial(_attn_block_kernel, num_heads=nh, head_dim=hd,
                   rotary_dim=rd, latent_dim=latent, scale=1.0 / math.sqrt(hd))
    w1, w2, w3, wo = blk['attn_w1'], blk['attn_w2'], blk['attn_w3'], blk['attn_wo']
    return pl.pallas_call(
        kern,
        out_shape=jax.ShapeDtypeStruct((bt, hidden), x.dtype),
        grid=(batch,),
        in_specs=[
            pl.BlockSpec((seq, hidden), lambda b: (b, 0)),
            _full_spec(blk['ln_1']),
            _full_spec(w1), _full_spec(w2), _full_spec(w3), _full_spec(wo),
            _full_spec(cos), _full_spec(sin), _full_spec(rot),
        ],
        out_specs=pl.BlockSpec((seq, hidden), lambda b: (b, 0)),
        compiler_params=pltpu.CompilerParams(dimension_semantics=("parallel",)),
    )(x, blk['ln_1'], w1, w2, w3, wo, cos, sin, rot)


def _moe_block_kernel(x_ref, g_ref, sgw_ref, suw_ref, sdw_ref,
                      rgw_ref, ruw_ref, rdw_ref, rw_ref, rb_ref, o_ref,
                      *, num_shared, num_routed, top_k):
    """out = x + MoE(LN_2(x)) (shared experts + sigmoid top-k routed experts)."""
    x = x_ref[...].astype(jnp.float32)
    h = _layernorm(x, g_ref[...].astype(jnp.float32))

    def swiglu_expert(gate_w, up_w, down_w):
        g = _mm(h, gate_w)
        u = _mm(h, up_w)
        return _mm(g * jax.nn.sigmoid(g) * u, down_w)        # down(SiLU(gate)*up)

    shared = swiglu_expert(sgw_ref[0], suw_ref[0], sdw_ref[0])
    for s in range(1, num_shared):
        shared = shared + swiglu_expert(sgw_ref[s], suw_ref[s], sdw_ref[s])
    shared = shared * (1.0 / num_shared)

    # Sigmoid routing + normalized top-k, done with static compares per expert
    # (no lax.top_k needed for a small routed-expert count).
    logits = _mm(h, rw_ref[...]) + rb_ref[...]
    probs = jax.nn.sigmoid(logits)                           # (rows, E)
    selected = []
    for e in range(num_routed):
        p_e = probs[:, e:e + 1]
        rank = jnp.zeros_like(p_e)
        for j in range(num_routed):
            if j == e:
                continue
            p_j = probs[:, j:j + 1]
            beats = (p_j >= p_e) if j < e else (p_j > p_e)   # stable tie-break
            rank = rank + beats.astype(jnp.float32)
        selected.append(jnp.where(rank < top_k, p_e, 0.0))
    denom = selected[0]
    for e in range(1, num_routed):
        denom = denom + selected[e]
    inv_denom = 1.0 / denom                                  # top-k probs > 0

    # Dense routed compute weighted by the zeroed/normalized top-k probs —
    # identical result to the reference's masked scatter-add.
    # TODO(synk): at real expert counts use PrefetchScalarGridSpec with
    # router-derived token offsets so only the top_k experts' tokens are computed.
    out = x + shared
    for e in range(num_routed):
        w_e = selected[e] * inv_denom                        # (rows, 1)
        out = out + swiglu_expert(rgw_ref[e], ruw_ref[e], rdw_ref[e]) * w_e
    o_ref[...] = out.astype(o_ref.dtype)
    # TODO(synk): expert_load bookkeeping (training-time side effect) is not
    # reproduced; it does not affect the forward output.


def moe_block(x, blk, cfg):
    """x: (B*T, H) -> (B*T, H). Fused LN2 + MoE + residual, grid over row chunks."""
    rows, hidden = x.shape
    num_shared = cfg.num_shared_experts
    num_routed = cfg.num_experts - cfg.num_shared_experts
    rb = 8 if rows % 8 == 0 else rows
    kern = partial(_moe_block_kernel, num_shared=num_shared,
                   num_routed=num_routed, top_k=cfg.top_k)
    return pl.pallas_call(
        kern,
        out_shape=jax.ShapeDtypeStruct((rows, hidden), x.dtype),
        grid=(rows // rb,),
        in_specs=[
            pl.BlockSpec((rb, hidden), lambda i: (i, 0)),
            _full_spec(blk['ln_2']),
            _full_spec(blk['moe_sgw']), _full_spec(blk['moe_suw']),
            _full_spec(blk['moe_sdw']),
            _full_spec(blk['moe_rgw']), _full_spec(blk['moe_ruw']),
            _full_spec(blk['moe_rdw']),
            _full_spec(blk['moe_router']), _full_spec(blk['moe_bias']),
        ],
        out_specs=pl.BlockSpec((rb, hidden), lambda i: (i, 0)),
        compiler_params=pltpu.CompilerParams(dimension_semantics=("parallel",)),
    )(x, blk['ln_2'], blk['moe_sgw'], blk['moe_suw'], blk['moe_sdw'],
      blk['moe_rgw'], blk['moe_ruw'], blk['moe_rdw'],
      blk['moe_router'], blk['moe_bias'])


def _lm_head_kernel(x_ref, g_ref, w_ref, o_ref):
    """out = LN_f(x) @ W_head (tied embedding) — fused so the narrow vocab
    output never needs its own launch."""
    x = x_ref[...].astype(jnp.float32)
    h = _layernorm(x, g_ref[...].astype(jnp.float32))
    o_ref[...] = _mm(h, w_ref[...]).astype(o_ref.dtype)


def lm_head_block(x, gamma, w):
    rows, hidden = x.shape
    vocab = w.shape[1]
    rb = 8 if rows % 8 == 0 else rows
    return pl.pallas_call(
        _lm_head_kernel,
        out_shape=jax.ShapeDtypeStruct((rows, vocab), x.dtype),
        grid=(rows // rb,),
        in_specs=[pl.BlockSpec((rb, hidden), lambda i: (i, 0)),
                  _full_spec(gamma), _full_spec(w)],
        out_specs=pl.BlockSpec((rb, vocab), lambda i: (i, 0)),
        compiler_params=pltpu.CompilerParams(dimension_semantics=("parallel",)),
    )(x, gamma, w)


# ------------------------------- Model (glue) -------------------------------

class DeepSeekConfig:
    vocab_size = 64
    hidden_size = 32
    n_layer = 2
    block_size = 16
    num_attention_heads = 2
    head_dim = 16            # num_heads * head_dim == hidden_size
    rotary_dim = 8
    compression_ratio = 2
    num_experts = 4
    num_shared_experts = 1
    top_k = 2
    mlp_ratio = 2.0
    rope_base = 10000.0
    rope_scaling_factor = 1.0


def init_params(cfg, key):
    keys = iter(jax.random.split(key, 512))

    def lin(in_f, out_f, std=0.02):
        return jax.random.normal(next(keys), (in_f, out_f), jnp.float32) * std

    H = cfg.hidden_size
    L = H // cfg.compression_ratio
    nh, hd, rd = cfg.num_attention_heads, cfg.head_dim, cfg.rotary_dim
    I = int(H * cfg.mlp_ratio)
    n_routed = cfg.num_experts - cfg.num_shared_experts

    def expert():
        return dict(gate=lin(H, I), up=lin(H, I), down=lin(I, H))

    params = dict(
        # tied with lm_head (weight sharing), init std 0.02 like the Linear init
        wte=jax.random.normal(next(keys), (cfg.vocab_size, H), jnp.float32) * 0.02,
        ln_f=jnp.ones((H,), jnp.float32),
        blocks=[],
    )
    for _ in range(cfg.n_layer):
        blk = dict(
            ln_1=jnp.ones((H,), jnp.float32),
            ln_2=jnp.ones((H,), jnp.float32),
            attn=dict(
                kv_proj_d=lin(H, L), q_proj_d=lin(H, L),
                k_proj_u=lin(L, nh * hd), q_proj_u=lin(L, nh * hd),
                v_proj_u=lin(L, nh * hd),
                rope_q=lin(L, nh * rd), rope_k=lin(H, nh * rd),
                o_proj=lin(H, H),
            ),
            moe=dict(
                shared=[expert() for _ in range(cfg.num_shared_experts)],
                routed=[expert() for _ in range(n_routed)],
                router=lin(H, n_routed),
                routing_bias=jnp.zeros((n_routed,), jnp.float32),
            ),
        )
        params['blocks'].append(blk)
    return params


def fuse_params(params, cfg):
    """Reorganize raw params into the fused-kernel layout (done once, outside jit)."""
    H = cfg.hidden_size
    nh, rd = cfg.num_attention_heads, cfg.rotary_dim

    # RoPE tables for all block_size positions, tiled across heads, plus the
    # rotate_half matrix so RoPE is pure elementwise + matmul inside the kernel.
    inv_freq = 1.0 / (cfg.rope_base ** (jnp.arange(0, rd, 2, dtype=jnp.float32) / rd))
    t = jnp.arange(cfg.block_size, dtype=jnp.float32)
    freqs = jnp.outer(t, inv_freq)
    emb = jnp.concatenate([freqs, freqs], axis=-1)                    # (block, rd)
    cos = jnp.cos(emb) * cfg.rope_scaling_factor
    sin = jnp.sin(emb) * cfg.rope_scaling_factor
    half = rd // 2
    eye = jnp.eye(half, dtype=jnp.float32)
    zero = jnp.zeros((half, half), jnp.float32)
    rot_single = jnp.block([[zero, eye], [-eye, zero]])               # u @ rot == rotate_half(u)
    rot = jnp.kron(jnp.eye(nh, dtype=jnp.float32), rot_single)        # (nh*rd, nh*rd)

    fused = dict(
        wte=params['wte'],
        ln_f=params['ln_f'].reshape(1, H),
        lm_head_w=params['wte'].T,                                    # tied lm_head (H, V)
        rope_cos=jnp.tile(cos, (1, nh)),                              # (block, nh*rd)
        rope_sin=jnp.tile(sin, (1, nh)),
        rope_rot=rot,
        blocks=[],
    )
    for blk in params['blocks']:
        a, m = blk['attn'], blk['moe']
        fused['blocks'].append(dict(
            ln_1=blk['ln_1'].reshape(1, H),
            ln_2=blk['ln_2'].reshape(1, H),
            # merged projections that share an input (lane-dense single matmuls)
            attn_w1=jnp.concatenate([a['kv_proj_d'], a['q_proj_d'], a['rope_k']], axis=1),
            attn_w2=jnp.concatenate([a['k_proj_u'], a['v_proj_u']], axis=1),
            attn_w3=jnp.concatenate([a['q_proj_u'], a['rope_q']], axis=1),
            attn_wo=a['o_proj'],
            # stacked expert weights -> one MoE kernel handles all experts
            moe_sgw=jnp.stack([e['gate'] for e in m['shared']]),
            moe_suw=jnp.stack([e['up'] for e in m['shared']]),
            moe_sdw=jnp.stack([e['down'] for e in m['shared']]),
            moe_rgw=jnp.stack([e['gate'] for e in m['routed']]),
            moe_ruw=jnp.stack([e['up'] for e in m['routed']]),
            moe_rdw=jnp.stack([e['down'] for e in m['routed']]),
            moe_router=m['router'],
            moe_bias=m['routing_bias'].reshape(1, -1),
        ))
    return fused


def deepseek_forward(fused, idx, cfg):
    B, T = idx.shape
    assert T <= cfg.block_size
    # TODO(synk): pad T to a multiple of 8 for the batched attention grid when
    # B > 1 and T % 8 != 0 (not needed for this demo config).
    assert T % 8 == 0 or B == 1
    H = cfg.hidden_size
    x = fused['wte'][idx].reshape(B * T, H)       # token embedding (XLA gather)
    cos = fused['rope_cos'][:T]
    sin = fused['rope_sin'][:T]
    rot = fused['rope_rot']
    for blk in fused['blocks']:
        x = attention_block(x, blk, cfg, cos, sin, rot, B, T)
        x = moe_block(x, blk, cfg)
    logits = lm_head_block(x, fused['ln_f'], fused['lm_head_w'])
    return logits.reshape(B, T, cfg.vocab_size)


# ---------------------------------- main -----------------------------------

if __name__ == "__main__":
    cfg = DeepSeekConfig()
    key = jax.random.PRNGKey(0)
    pkey, ikey = jax.random.split(key)
    params = init_params(cfg, pkey)
    fused = fuse_params(params, cfg)

    B, T = 2, 8
    idx = jax.random.randint(ikey, (B, T), 0, cfg.vocab_size, dtype=jnp.int32)

    fwd = jax.jit(partial(deepseek_forward, cfg=cfg))
    logits = fwd(fused, idx)
    logits = jax.block_until_ready(logits)

    assert logits.shape == (B, T, cfg.vocab_size)
    assert bool(jnp.all(jnp.isfinite(logits)))
    print("KERNEL_OK")
</pallas_src>

<mosaic_0001>
module attributes {stable_mosaic.version = 11 : i64} {
  func.func @_attn_block_kernel(%arg0: i32, %arg1: memref<8x32xf32, #tpu.memory_space<vmem>>, %arg2: memref<1x32xf32, #tpu.memory_space<vmem>>, %arg3: memref<32x48xf32, #tpu.memory_space<vmem>>, %arg4: memref<16x64xf32, #tpu.memory_space<vmem>>, %arg5: memref<16x48xf32, #tpu.memory_space<vmem>>, %arg6: memref<32x32xf32, #tpu.memory_space<vmem>>, %arg7: memref<8x16xf32, #tpu.memory_space<vmem>>, %arg8: memref<8x16xf32, #tpu.memory_space<vmem>>, %arg9: memref<16x16xf32, #tpu.memory_space<vmem>>, %arg10: memref<8x32xf32, #tpu.memory_space<vmem>>) attributes {dimension_semantics = [#tpu.dimension_semantics<parallel>], iteration_bounds = array<i64: 2>, scalar_prefetch = 0 : i64, scratch_operands = 0 : i64, tpu.core_type = #tpu.core_type<tc>, window_params = [{transform_indices = @transform_0, window_bounds = array<i64: 8, 32>}, {pipeline_mode = #tpu.pipeline_mode<synchronous>, transform_indices = @transform_1, window_bounds = array<i64: 1, 32>}, {pipeline_mode = #tpu.pipeline_mode<synchronous>, transform_indices = @transform_2, window_bounds = array<i64: 32, 48>}, {pipeline_mode = #tpu.pipeline_mode<synchronous>, transform_indices = @transform_3, window_bounds = array<i64: 16, 64>}, {pipeline_mode = #tpu.pipeline_mode<synchronous>, transform_indices = @transform_4, window_bounds = array<i64: 16, 48>}, {pipeline_mode = #tpu.pipeline_mode<synchronous>, transform_indices = @transform_5, window_bounds = array<i64: 32, 32>}, {pipeline_mode = #tpu.pipeline_mode<synchronous>, transform_indices = @transform_6, window_bounds = array<i64: 8, 16>}, {pipeline_mode = #tpu.pipeline_mode<synchronous>, transform_indices = @transform_7, window_bounds = array<i64: 8, 16>}, {pipeline_mode = #tpu.pipeline_mode<synchronous>, transform_indices = @transform_8, window_bounds = array<i64: 16, 16>}, {transform_indices = @transform_9, window_bounds = array<i64: 8, 32>}]} {
    %c0 = arith.constant 0 : index
    %c0_0 = arith.constant 0 : index
    %0 = vector.load %arg1[%c0, %c0_0] : memref<8x32xf32, #tpu.memory_space<vmem>>, vector<8x32xf32>
    %c0_1 = arith.constant 0 : index
    %c0_2 = arith.constant 0 : index
    %1 = vector.load %arg2[%c0_1, %c0_2] : memref<1x32xf32, #tpu.memory_space<vmem>>, vector<1x32xf32>
    %cst = arith.constant dense<0.000000e+00> : vector<8xf32>
    %2 = vector.multi_reduction <add>, %0, %cst [1] : vector<8x32xf32> to vector<8xf32>
    %3 = vector.shape_cast %2 : vector<8xf32> to vector<8x1xf32>
    %cst_3 = arith.constant 3.200000e+01 : f32
    %4 = vector.broadcast %cst_3 : f32 to vector<8x1xf32>
    %5 = arith.divf %3, %4 : vector<8x1xf32>
    %6 = vector.broadcast %5 : vector<8x1xf32> to vector<8x32xf32>
    %7 = arith.subf %0, %6 : vector<8x32xf32>
    %8 = arith.mulf %7, %7 : vector<8x32xf32>
    %cst_4 = arith.constant dense<0.000000e+00> : vector<8xf32>
    %9 = vector.multi_reduction <add>, %8, %cst_4 [1] : vector<8x32xf32> to vector<8xf32>
    %10 = vector.shape_cast %9 : vector<8xf32> to vector<8x1xf32>
    %cst_5 = arith.constant 3.200000e+01 : f32
    %11 = vector.broadcast %cst_5 : f32 to vector<8x1xf32>
    %12 = arith.divf %10, %11 : vector<8x1xf32>
    %13 = vector.broadcast %5 : vector<8x1xf32> to vector<8x32xf32>
    %14 = arith.subf %0, %13 : vector<8x32xf32>
    %cst_6 = arith.constant 9.99999974E-6 : f32
    %15 = vector.broadcast %cst_6 : f32 to vector<8x1xf32>
    %16 = arith.addf %12, %15 : vector<8x1xf32>
    %17 = math.rsqrt %16 : vector<8x1xf32>
    %18 = vector.broadcast %17 : vector<8x1xf32> to vector<8x32xf32>
    %19 = arith.mulf %14, %18 : vector<8x32xf32>
    %20 = vector.broadcast %1 : vector<1x32xf32> to vector<8x32xf32>
    %21 = arith.mulf %19, %20 : vector<8x32xf32>
    %c0_7 = arith.constant 0 : index
    %c0_8 = arith.constant 0 : index
    %22 = vector.load %arg3[%c0_7, %c0_8] : memref<32x48xf32, #tpu.memory_space<vmem>>, vector<32x48xf32>
    %cst_9 = arith.constant dense<0.000000e+00> : vector<8x48xf32>
    %23 = tpu.matmul %21, %22, %cst_9 {dimension_numbers = #tpu.dot_dimension_numbers<[1], [0], [0], [1], [0, 0, 1, 1], [], []>} : vector<8x32xf32>, vector<32x48xf32>, vector<8x48xf32> -> vector<8x48xf32>
    %24 = vector.extract_strided_slice %23 {offsets = [0, 0], sizes = [8, 16], strides = [1, 1]} : vector<8x48xf32> to vector<8x16xf32>
    %25 = vector.extract_strided_slice %23 {offsets = [0, 16], sizes = [8, 16], strides = [1, 1]} : vector<8x48xf32> to vector<8x16xf32>
    %26 = vector.extract_strided_slice %23 {offsets = [0, 32], sizes = [8, 16], strides = [1, 1]} : vector<8x48xf32> to vector<8x16xf32>
    %c0_10 = arith.constant 0 : index
    %c0_11 = arith.constant 0 : index
    %27 = vector.load %arg4[%c0_10, %c0_11] : memref<16x64xf32, #tpu.memory_space<vmem>>, vector<16x64xf32>
    %cst_12 = arith.constant dense<0.000000e+00> : vector<8x64xf32>
    %28 = tpu.matmul %24, %27, %cst_12 {dimension_numbers = #tpu.dot_dimension_numbers<[1], [0], [0], [1], [0, 0, 1, 1], [], []>} : vector<8x16xf32>, vector<16x64xf32>, vector<8x64xf32> -> vector<8x64xf32>
    %c0_13 = arith.constant 0 : index
    %c0_14 = arith.constant 0 : index
    %29 = vector.load %arg5[%c0_13, %c0_14] : memref<16x48xf32, #tpu.memory_space<vmem>>, vector<16x48xf32>
    %cst_15 = arith.constant dense<0.000000e+00> : vector<8x48xf32>
    %30 = tpu.matmul %25, %29, %cst_15 {dimension_numbers = #tpu.dot_dimension_numbers<[1], [0], [0], [1], [0, 0, 1, 1], [], []>} : vector<8x16xf32>, vector<16x48xf32>, vector<8x48xf32> -> vector<8x48xf32>
    %31 = vector.extract_strided_slice %28 {offsets = [0, 0], sizes = [8, 32], strides = [1, 1]} : vector<8x64xf32> to vector<8x32xf32>
    %32 = vector.extract_strided_slice %28 {offsets = [0, 32], sizes = [8, 32], strides = [1, 1]} : vector<8x64xf32> to vector<8x32xf32>
    %33 = vector.extract_strided_slice %30 {offsets = [0, 0], sizes = [8, 32], strides = [1, 1]} : vector<8x48xf32> to vector<8x32xf32>
    %34 = vector.extract_strided_slice %30 {offsets = [0, 32], sizes = [8, 16], strides = [1, 1]} : vector<8x48xf32> to vector<8x16xf32>
    %c0_16 = arith.constant 0 : index
    %c0_17 = arith.constant 0 : index
    %35 = vector.load %arg7[%c0_16, %c0_17] : memref<8x16xf32, #tpu.memory_space<vmem>>, vector<8x16xf32>
    %c0_18 = arith.constant 0 : index
    %c0_19 = arith.constant 0 : index
    %36 = vector.load %arg8[%c0_18, %c0_19] : memref<8x16xf32, #tpu.memory_space<vmem>>, vector<8x16xf32>
    %c0_20 = arith.constant 0 : index
    %c0_21 = arith.constant 0 : index
    %37 = vector.load %arg9[%c0_20, %c0_21] : memref<16x16xf32, #tpu.memory_space<vmem>>, vector<16x16xf32>
    %38 = arith.mulf %34, %35 : vector<8x16xf32>
    %cst_22 = arith.constant dense<0.000000e+00> : vector<8x16xf32>
    %39 = tpu.matmul %34, %37, %cst_22 {dimension_numbers = #tpu.dot_dimension_numbers<[1], [0], [0], [1], [0, 0, 1, 1], [], []>} : vector<8x16xf32>, vector<16x16xf32>, vector<8x16xf32> -> vector<8x16xf32>
    %40 = arith.mulf %39, %36 : vector<8x16xf32>
    %41 = arith.addf %38, %40 : vector<8x16xf32>
    %42 = arith.mulf %26, %35 : vector<8x16xf32>
    %cst_23 = arith.constant dense<0.000000e+00> : vector<8x16xf32>
    %43 = tpu.matmul %26, %37, %cst_23 {dimension_numbers = #tpu.dot_dimension_numbers<[1], [0], [0], [1], [0, 0, 1, 1], [], []>} : vector<8x16xf32>, vector<16x16xf32>, vector<8x16xf32> -> vector<8x16xf32>
    %44 = arith.mulf %43, %36 : vector<8x16xf32>
    %45 = arith.addf %42, %44 : vector<8x16xf32>
    %46 = tpu.iota {dimensions = array<i32: 0>} : vector<8x8xi32>
    %47 = tpu.iota {dimensions = array<i32: 1>} : vector<8x8xi32>
    %48 = arith.cmpi sle, %47, %46 : vector<8x8xi32>
    %c0_24 = arith.constant 0 : index
    %c0_25 = arith.constant 0 : index
    %49 = vector.load %arg6[%c0_24, %c0_25] : memref<32x32xf32, #tpu.memory_space<vmem>>, vector<32x32xf32>
    %cst_26 = arith.constant 0.000000e+00 : f32
    %50 = vector.broadcast %cst_26 : f32 to vector<8x32xf32>
    %51 = vector.extract_strided_slice %41 {offsets = [0, 0], sizes = [8, 8], strides = [1, 1]} : vector<8x16xf32> to vector<8x8xf32>
    %cst_27 = arith.constant 2.500000e-01 : f32
    %52 = vector.broadcast %cst_27 : f32 to vector<8x8xf32>
    %53 = arith.mulf %51, %52 : vector<8x8xf32>
    %54 = vector.extract_strided_slice %45 {offsets = [0, 0], sizes = [8, 8], strides = [1, 1]} : vector<8x16xf32> to vector<8x8xf32>
    %55 = tpu.transpose %54, [1, 0] : vector<8x8xf32> -> vector<8x8xf32>
    %cst_28 = arith.constant dense<0.000000e+00> : vector<8x8xf32>
    %56 = tpu.matmul %53, %55, %cst_28 {dimension_numbers = #tpu.dot_dimension_numbers<[1], [0], [0], [1], [0, 0, 1, 1], [], []>} : vector<8x8xf32>, vector<8x8xf32>, vector<8x8xf32> -> vector<8x8xf32>
    %57 = vector.extract_strided_slice %33 {offsets = [0, 8], sizes = [8, 8], strides = [1, 1]} : vector<8x32xf32> to vector<8x8xf32>
    %cst_29 = arith.constant 2.500000e-01 : f32
    %58 = vector.broadcast %cst_29 : f32 to vector<8x8xf32>
    %59 = arith.mulf %57, %58 : vector<8x8xf32>
    %60 = vector.extract_strided_slice %31 {offsets = [0, 8], sizes = [8, 8], strides = [1, 1]} : vector<8x32xf32> to vector<8x8xf32>
    %61 = tpu.transpose %60, [1, 0] : vector<8x8xf32> -> vector<8x8xf32>
    %cst_30 = arith.constant dense<0.000000e+00> : vector<8x8xf32>
    %62 = tpu.matmul %59, %61, %cst_30 {dimension_numbers = #tpu.dot_dimension_numbers<[1], [0], [0], [1], [0, 0, 1, 1], [], []>} : vector<8x8xf32>, vector<8x8xf32>, vector<8x8xf32> -> vector<8x8xf32>
    %63 = arith.addf %56, %62 : vector<8x8xf32>
    %cst_31 = arith.constant 0xFF800000 : f32
    %64 = vector.broadcast %cst_31 : f32 to vector<8x8xf32>
    %65 = arith.select %48, %63, %64 : vector<8x8xi1>, vector<8x8xf32>
    %cst_32 = arith.constant dense<0xFF800000> : vector<8xf32>
    %66 = vector.multi_reduction <maximumf>, %65, %cst_32 [1] : vector<8x8xf32> to vector<8xf32>
    %67 = vector.shape_cast %66 : vector<8xf32> to vector<8x1xf32>
    %68 = vector.broadcast %67 : vector<8x1xf32> to vector<8x8xf32>
    %69 = arith.subf %65, %68 : vector<8x8xf32>
    %70 = math.exp %69 : vector<8x8xf32>
    %cst_33 = arith.constant dense<0.000000e+00> : vector<8xf32>
    %71 = vector.multi_reduction <add>, %70, %cst_33 [1] : vector<8x8xf32> to vector<8xf32>
    %72 = vector.shape_cast %71 : vector<8xf32> to vector<8x1xf32>
    %73 = tpu.reciprocal %72 {approx = true} : vector<8x1xf32> -> vector<8x1xf32>
    %74 = vector.broadcast %73 : vector<8x1xf32> to vector<8x8xf32>
    %75 = arith.mulf %70, %74 : vector<8x8xf32>
    %76 = vector.extract_strided_slice %32 {offsets = [0, 0], sizes = [8, 16], strides = [1, 1]} : vector<8x32xf32> to vector<8x16xf32>
    %cst_34 = arith.constant dense<0.000000e+00> : vector<8x16xf32>
    %77 = tpu.matmul %75, %76, %cst_34 {dimension_numbers = #tpu.dot_dimension_numbers<[1], [0], [0], [1], [0, 0, 1, 1], [], []>} : vector<8x8xf32>, vector<8x16xf32>, vector<8x16xf32> -> vector<8x16xf32>
    %78 = vector.extract_strided_slice %49 {offsets = [0, 0], sizes = [16, 32], strides = [1, 1]} : vector<32x32xf32> to vector<16x32xf32>
    %cst_35 = arith.constant dense<0.000000e+00> : vector<8x32xf32>
    %79 = tpu.matmul %77, %78, %cst_35 {dimension_numbers = #tpu.dot_dimension_numbers<[1], [0], [0], [1], [0, 0, 1, 1], [], []>} : vector<8x16xf32>, vector<16x32xf32>, vector<8x32xf32> -> vector<8x32xf32>
    %80 = arith.addf %50, %79 : vector<8x32xf32>
    %81 = vector.extract_strided_slice %41 {offsets = [0, 8], sizes = [8, 8], strides = [1, 1]} : vector<8x16xf32> to vector<8x8xf32>
    %cst_36 = arith.constant 2.500000e-01 : f32
    %82 = vector.broadcast %cst_36 : f32 to vector<8x8xf32>
    %83 = arith.mulf %81, %82 : vector<8x8xf32>
    %84 = vector.extract_strided_slice %45 {offsets = [0, 8], sizes = [8, 8], strides = [1, 1]} : vector<8x16xf32> to vector<8x8xf32>
    %85 = tpu.transpose %84, [1, 0] : vector<8x8xf32> -> vector<8x8xf32>
    %cst_37 = arith.constant dense<0.000000e+00> : vector<8x8xf32>
    %86 = tpu.matmul %83, %85, %cst_37 {dimension_numbers = #tpu.dot_dimension_numbers<[1], [0], [0], [1], [0, 0, 1, 1], [], []>} : vector<8x8xf32>, vector<8x8xf32>, vector<8x8xf32> -> vector<8x8xf32>
    %87 = vector.extract_strided_slice %33 {offsets = [0, 24], sizes = [8, 8], strides = [1, 1]} : vector<8x32xf32> to vector<8x8xf32>
    %cst_38 = arith.constant 2.500000e-01 : f32
    %88 = vector.broadcast %cst_38 : f32 to vector<8x8xf32>
    %89 = arith.mulf %87, %88 : vector<8x8xf32>
    %90 = vector.extract_strided_slice %31 {offsets = [0, 24], sizes = [8, 8], strides = [1, 1]} : vector<8x32xf32> to vector<8x8xf32>
    %91 = tpu.transpose %90, [1, 0] : vector<8x8xf32> -> vector<8x8xf32>
    %cst_39 = arith.constant dense<0.000000e+00> : vector<8x8xf32>
    %92 = tpu.matmul %89, %91, %cst_39 {dimension_numbers = #tpu.dot_dimension_numbers<[1], [0], [0], [1], [0, 0, 1, 1], [], []>} : vector<8x8xf32>, vector<8x8xf32>, vector<8x8xf32> -> vector<8x8xf32>
    %93 = arith.addf %86, %92 : vector<8x8xf32>
    %cst_40 = arith.constant 0xFF800000 : f32
    %94 = vector.broadcast %cst_40 : f32 to vector<8x8xf32>
    %95 = arith.select %48, %93, %94 : vector<8x8xi1>, vector<8x8xf32>
    %cst_41 = arith.constant dense<0xFF800000> : vector<8xf32>
    %96 = vector.multi_reduction <maximumf>, %95, %cst_41 [1] : vector<8x8xf32> to vector<8xf32>
    %97 = vector.shape_cast %96 : vector<8xf32> to vector<8x1xf32>
    %98 = vector.broadcast %97 : vector<8x1xf32> to vector<8x8xf32>
    %99 = arith.subf %95, %98 : vector<8x8xf32>
    %100 = math.exp %99 : vector<8x8xf32>
    %cst_42 = arith.constant dense<0.000000e+00> : vector<8xf32>
    %101 = vector.multi_reduction <add>, %100, %cst_42 [1] : vector<8x8xf32> to vector<8xf32>
    %102 = vector.shape_cast %101 : vector<8xf32> to vector<8x1xf32>
    %103 = tpu.reciprocal %102 {approx = true} : vector<8x1xf32> -> vector<8x1xf32>
    %104 = vector.broadcast %103 : vector<8x1xf32> to vector<8x8xf32>
    %105 = arith.mulf %100, %104 : vector<8x8xf32>
    %106 = vector.extract_strided_slice %32 {offsets = [0, 16], sizes = [8, 16], strides = [1, 1]} : vector<8x32xf32> to vector<8x16xf32>
    %cst_43 = arith.constant dense<0.000000e+00> : vector<8x16xf32>
    %107 = tpu.matmul %105, %106, %cst_43 {dimension_numbers = #tpu.dot_dimension_numbers<[1], [0], [0], [1], [0, 0, 1, 1], [], []>} : vector<8x8xf32>, vector<8x16xf32>, vector<8x16xf32> -> vector<8x16xf32>
    %108 = vector.extract_strided_slice %49 {offsets = [16, 0], sizes = [16, 32], strides = [1, 1]} : vector<32x32xf32> to vector<16x32xf32>
    %cst_44 = arith.constant dense<0.000000e+00> : vector<8x32xf32>
    %109 = tpu.matmul %107, %108, %cst_44 {dimension_numbers = #tpu.dot_dimension_numbers<[1], [0], [0], [1], [0, 0, 1, 1], [], []>} : vector<8x16xf32>, vector<16x32xf32>, vector<8x32xf32> -> vector<8x32xf32>
    %110 = arith.addf %80, %109 : vector<8x32xf32>
    %111 = arith.addf %0, %110 : vector<8x32xf32>
    %c0_45 = arith.constant 0 : index
    %c0_46 = arith.constant 0 : index
    %112 = vector.load %arg10[%c0_45, %c0_46] : memref<8x32xf32, #tpu.memory_space<vmem>>, vector<8x32xf32>
    tpu.vector_store %arg10[%c0_45, %c0_46], %111 {strides = array<i32>} : memref<8x32xf32, #tpu.memory_space<vmem>>, vector<8x32xf32>,
    return
  }
  func.func @transform_0(%arg0: i32) -> (i32, i32) {
    %c0_i32 = arith.constant 0 : i32
    %c0_i32_0 = arith.constant 0 : i32
    return %arg0, %c0_i32 : i32, i32
  }
  func.func @transform_1(%arg0: i32) -> (i32, i32) {
    %c0_i32 = arith.constant 0 : i32
    %c0_i32_0 = arith.constant 0 : i32
    %c0_i32_1 = arith.constant 0 : i32
    return %c0_i32, %c0_i32_0 : i32, i32
  }
  func.func @transform_2(%arg0: i32) -> (i32, i32) {
    %c0_i32 = arith.constant 0 : i32
    %c0_i32_0 = arith.constant 0 : i32
    %c0_i32_1 = arith.constant 0 : i32
    return %c0_i32, %c0_i32_0 : i32, i32
  }
  func.func @transform_3(%arg0: i32) -> (i32, i32) {
    %c0_i32 = arith.constant 0 : i32
    %c0_i32_0 = arith.constant 0 : i32
    %c0_i32_1 = arith.constant 0 : i32
    return %c0_i32, %c0_i32_0 : i32, i32
  }
  func.func @transform_4(%arg0: i32) -> (i32, i32) {
    %c0_i32 = arith.constant 0 : i32
    %c0_i32_0 = arith.constant 0 : i32
    %c0_i32_1 = arith.constant 0 : i32
    return %c0_i32, %c0_i32_0 : i32, i32
  }
  func.func @transform_5(%arg0: i32) -> (i32, i32) {
    %c0_i32 = arith.constant 0 : i32
    %c0_i32_0 = arith.constant 0 : i32
    %c0_i32_1 = arith.constant 0 : i32
    return %c0_i32, %c0_i32_0 : i32, i32
  }
  func.func @transform_6(%arg0: i32) -> (i32, i32) {
    %c0_i32 = arith.constant 0 : i32
    %c0_i32_0 = arith.constant 0 : i32
    %c0_i32_1 = arith.constant 0 : i32
    return %c0_i32, %c0_i32_0 : i32, i32
  }
  func.func @transform_7(%arg0: i32) -> (i32, i32) {
    %c0_i32 = arith.constant 0 : i32
    %c0_i32_0 = arith.constant 0 : i32
    %c0_i32_1 = arith.constant 0 : i32
    return %c0_i32, %c0_i32_0 : i32, i32
  }
  func.func @transform_8(%arg0: i32) -> (i32, i32) {
    %c0_i32 = arith.constant 0 : i32
    %c0_i32_0 = arith.constant 0 : i32
    %c0_i32_1 = arith.constant 0 : i32
    return %c0_i32, %c0_i32_0 : i32, i32
  }
  func.func @transform_9(%arg0: i32) -> (i32, i32) {
    %c0_i32 = arith.constant 0 : i32
    %c0_i32_0 = arith.constant 0 : i32
    return %arg0, %c0_i32 : i32, i32
  }
}

module attributes {stable_mosaic.version = 11 : i64} {
  func.func @_lm_head_kernel(%arg0: i32, %arg1: memref<8x32xf32, #tpu.memory_space<vmem>>, %arg2: memref<1x32xf32, #tpu.memory_space<vmem>>, %arg3: memref<32x64xf32, #tpu.memory_space<vmem>>, %arg4: memref<8x64xf32, #tpu.memory_space<vmem>>) attributes {dimension_semantics = [#tpu.dimension_semantics<parallel>], iteration_bounds = array<i64: 2>, scalar_prefetch = 0 : i64, scratch_operands = 0 : i64, tpu.core_type = #tpu.core_type<tc>, window_params = [{transform_indices = @transform_0, window_bounds = array<i64: 8, 32>}, {pipeline_mode = #tpu.pipeline_mode<synchronous>, transform_indices = @transform_1, window_bounds = array<i64: 1, 32>}, {pipeline_mode = #tpu.pipeline_mode<synchronous>, transform_indices = @transform_2, window_bounds = array<i64: 32, 64>}, {transform_indices = @transform_3, window_bounds = array<i64: 8, 64>}]} {
    %c0 = arith.constant 0 : index
    %c0_0 = arith.constant 0 : index
    %0 = vector.load %arg1[%c0, %c0_0] : memref<8x32xf32, #tpu.memory_space<vmem>>, vector<8x32xf32>
    %c0_1 = arith.constant 0 : index
    %c0_2 = arith.constant 0 : index
    %1 = vector.load %arg2[%c0_1, %c0_2] : memref<1x32xf32, #tpu.memory_space<vmem>>, vector<1x32xf32>
    %cst = arith.constant dense<0.000000e+00> : vector<8xf32>
    %2 = vector.multi_reduction <add>, %0, %cst [1] : vector<8x32xf32> to vector<8xf32>
    %3 = vector.shape_cast %2 : vector<8xf32> to vector<8x1xf32>
    %cst_3 = arith.constant 3.200000e+01 : f32
    %4 = vector.broadcast %cst_3 : f32 to vector<8x1xf32>
    %5 = arith.divf %3, %4 : vector<8x1xf32>
    %6 = vector.broadcast %5 : vector<8x1xf32> to vector<8x32xf32>
    %7 = arith.subf %0, %6 : vector<8x32xf32>
    %8 = arith.mulf %7, %7 : vector<8x32xf32>
    %cst_4 = arith.constant dense<0.000000e+00> : vector<8xf32>
    %9 = vector.multi_reduction <add>, %8, %cst_4 [1] : vector<8x32xf32> to vector<8xf32>
    %10 = vector.shape_cast %9 : vector<8xf32> to vector<8x1xf32>
    %cst_5 = arith.constant 3.200000e+01 : f32
    %11 = vector.broadcast %cst_5 : f32 to vector<8x1xf32>
    %12 = arith.divf %10, %11 : vector<8x1xf32>
    %13 = vector.broadcast %5 : vector<8x1xf32> to vector<8x32xf32>
    %14 = arith.subf %0, %13 : vector<8x32xf32>
    %cst_6 = arith.constant 9.99999974E-6 : f32
    %15 = vector.broadcast %cst_6 : f32 to vector<8x1xf32>
    %16 = arith.addf %12, %15 : vector<8x1xf32>
    %17 = math.rsqrt %16 : vector<8x1xf32>
    %18 = vector.broadcast %17 : vector<8x1xf32> to vector<8x32xf32>
    %19 = arith.mulf %14, %18 : vector<8x32xf32>
    %20 = vector.broadcast %1 : vector<1x32xf32> to vector<8x32xf32>
    %21 = arith.mulf %19, %20 : vector<8x32xf32>
    %c0_7 = arith.constant 0 : index
    %c0_8 = arith.constant 0 : index
    %22 = vector.load %arg3[%c0_7, %c0_8] : memref<32x64xf32, #tpu.memory_space<vmem>>, vector<32x64xf32>
    %cst_9 = arith.constant dense<0.000000e+00> : vector<8x64xf32>
    %23 = tpu.matmul %21, %22, %cst_9 {dimension_numbers = #tpu.dot_dimension_numbers<[1], [0], [0], [1], [0, 0, 1, 1], [], []>} : vector<8x32xf32>, vector<32x64xf32>, vector<8x64xf32> -> vector<8x64xf32>
    %c0_10 = arith.constant 0 : index
    %c0_11 = arith.constant 0 : index
    %24 = vector.load %arg4[%c0_10, %c0_11] : memref<8x64xf32, #tpu.memory_space<vmem>>, vector<8x64xf32>
    tpu.vector_store %arg4[%c0_10, %c0_11], %23 {strides = array<i32>} : memref<8x64xf32, #tpu.memory_space<vmem>>, vector<8x64xf32>,
    return
  }
  func.func @transform_0(%arg0: i32) -> (i32, i32) {
    %c0_i32 = arith.constant 0 : i32
    %c0_i32_0 = arith.constant 0 : i32
    return %arg0, %c0_i32 : i32, i32
  }
  func.func @transform_1(%arg0: i32) -> (i32, i32) {
    %c0_i32 = arith.constant 0 : i32
    %c0_i32_0 = arith.constant 0 : i32
    %c0_i32_1 = arith.constant 0 : i32
    return %c0_i32, %c0_i32_0 : i32, i32
  }
  func.func @transform_2(%arg0: i32) -> (i32, i32) {
    %c0_i32 = arith.constant 0 : i32
    %c0_i32_0 = arith.constant 0 : i32
    %c0_i32_1 = arith.constant 0 : i32
    return %c0_i32, %c0_i32_0 : i32, i32
  }
  func.func @transform_3(%arg0: i32) -> (i32, i32) {
    %c0_i32 = arith.constant 0 : i32
    %c0_i32_0 = arith.constant 0 : i32
    return %arg0, %c0_i32 : i32, i32
  }
}

module attributes {stable_mosaic.version = 11 : i64} {
  func.func @_moe_block_kernel(%arg0: i32, %arg1: memref<8x32xf32, #tpu.memory_space<vmem>>, %arg2: memref<1x32xf32, #tpu.memory_space<vmem>>, %arg3: memref<1x32x64xf32, #tpu.memory_space<vmem>>, %arg4: memref<1x32x64xf32, #tpu.memory_space<vmem>>, %arg5: memref<1x64x32xf32, #tpu.memory_space<vmem>>, %arg6: memref<3x32x64xf32, #tpu.memory_space<vmem>>, %arg7: memref<3x32x64xf32, #tpu.memory_space<vmem>>, %arg8: memref<3x64x32xf32, #tpu.memory_space<vmem>>, %arg9: memref<32x3xf32, #tpu.memory_space<vmem>>, %arg10: memref<1x3xf32, #tpu.memory_space<vmem>>, %arg11: memref<8x32xf32, #tpu.memory_space<vmem>>) attributes {dimension_semantics = [#tpu.dimension_semantics<parallel>], iteration_bounds = array<i64: 2>, scalar_prefetch = 0 : i64, scratch_operands = 0 : i64, tpu.core_type = #tpu.core_type<tc>, window_params = [{transform_indices = @transform_0, window_bounds = array<i64: 8, 32>}, {pipeline_mode = #tpu.pipeline_mode<synchronous>, transform_indices = @transform_1, window_bounds = array<i64: 1, 32>}, {pipeline_mode = #tpu.pipeline_mode<synchronous>, transform_indices = @transform_2, window_bounds = array<i64: 1, 32, 64>}, {pipeline_mode = #tpu.pipeline_mode<synchronous>, transform_indices = @transform_3, window_bounds = array<i64: 1, 32, 64>}, {pipeline_mode = #tpu.pipeline_mode<synchronous>, transform_indices = @transform_4, window_bounds = array<i64: 1, 64, 32>}, {pipeline_mode = #tpu.pipeline_mode<synchronous>, transform_indices = @transform_5, window_bounds = array<i64: 3, 32, 64>}, {pipeline_mode = #tpu.pipeline_mode<synchronous>, transform_indices = @transform_6, window_bounds = array<i64: 3, 32, 64>}, {pipeline_mode = #tpu.pipeline_mode<synchronous>, transform_indices = @transform_7, window_bounds = array<i64: 3, 64, 32>}, {pipeline_mode = #tpu.pipeline_mode<synchronous>, transform_indices = @transform_8, window_bounds = array<i64: 32, 3>}, {pipeline_mode = #tpu.pipeline_mode<synchronous>, transform_indices = @transform_9, window_bounds = array<i64: 1, 3>}, {transform_indices = @transform_10, window_bounds = array<i64: 8, 32>}]} {
    %c0 = arith.constant 0 : index
    %c0_0 = arith.constant 0 : index
    %0 = vector.load %arg1[%c0, %c0_0] : memref<8x32xf32, #tpu.memory_space<vmem>>, vector<8x32xf32>
    %c0_1 = arith.constant 0 : index
    %c0_2 = arith.constant 0 : index
    %1 = vector.load %arg2[%c0_1, %c0_2] : memref<1x32xf32, #tpu.memory_space<vmem>>, vector<1x32xf32>
    %cst = arith.constant dense<0.000000e+00> : vector<8xf32>
    %2 = vector.multi_reduction <add>, %0, %cst [1] : vector<8x32xf32> to vector<8xf32>
    %3 = vector.shape_cast %2 : vector<8xf32> to vector<8x1xf32>
    %cst_3 = arith.constant 3.200000e+01 : f32
    %4 = vector.broadcast %cst_3 : f32 to vector<8x1xf32>
    %5 = arith.divf %3, %4 : vector<8x1xf32>
    %6 = vector.broadcast %5 : vector<8x1xf32> to vector<8x32xf32>
    %7 = arith.subf %0, %6 : vector<8x32xf32>
    %8 = arith.mulf %7, %7 : vector<8x32xf32>
    %cst_4 = arith.constant dense<0.000000e+00> : vector<8xf32>
    %9 = vector.multi_reduction <add>, %8, %cst_4 [1] : vector<8x32xf32> to vector<8xf32>
    %10 = vector.shape_cast %9 : vector<8xf32> to vector<8x1xf32>
    %cst_5 = arith.constant 3.200000e+01 : f32
    %11 = vector.broadcast %cst_5 : f32 to vector<8x1xf32>
    %12 = arith.divf %10, %11 : vector<8x1xf32>
    %13 = vector.broadcast %5 : vector<8x1xf32> to vector<8x32xf32>
    %14 = arith.subf %0, %13 : vector<8x32xf32>
    %cst_6 = arith.constant 9.99999974E-6 : f32
    %15 = vector.broadcast %cst_6 : f32 to vector<8x1xf32>
    %16 = arith.addf %12, %15 : vector<8x1xf32>
    %17 = math.rsqrt %16 : vector<8x1xf32>
    %18 = vector.broadcast %17 : vector<8x1xf32> to vector<8x32xf32>
    %19 = arith.mulf %14, %18 : vector<8x32xf32>
    %20 = vector.broadcast %1 : vector<1x32xf32> to vector<8x32xf32>
    %21 = arith.mulf %19, %20 : vector<8x32xf32>
    %c0_7 = arith.constant 0 : index
    %c0_8 = arith.constant 0 : index
    %c0_9 = arith.constant 0 : index
    %22 = vector.load %arg3[%c0_7, %c0_8, %c0_9] : memref<1x32x64xf32, #tpu.memory_space<vmem>>, vector<1x32x64xf32>
    %23 = vector.shape_cast %22 : vector<1x32x64xf32> to vector<32x64xf32>
    %c0_10 = arith.constant 0 : index
    %c0_11 = arith.constant 0 : index
    %c0_12 = arith.constant 0 : index
    %24 = vector.load %arg4[%c0_10, %c0_11, %c0_12] : memref<1x32x64xf32, #tpu.memory_space<vmem>>, vector<1x32x64xf32>
    %25 = vector.shape_cast %24 : vector<1x32x64xf32> to vector<32x64xf32>
    %c0_13 = arith.constant 0 : index
    %c0_14 = arith.constant 0 : index
    %c0_15 = arith.constant 0 : index
    %26 = vector.load %arg5[%c0_13, %c0_14, %c0_15] : memref<1x64x32xf32, #tpu.memory_space<vmem>>, vector<1x64x32xf32>
    %27 = vector.shape_cast %26 : vector<1x64x32xf32> to vector<64x32xf32>
    %cst_16 = arith.constant dense<0.000000e+00> : vector<8x64xf32>
    %28 = tpu.matmul %21, %23, %cst_16 {dimension_numbers = #tpu.dot_dimension_numbers<[1], [0], [0], [1], [0, 0, 1, 1], [], []>} : vector<8x32xf32>, vector<32x64xf32>, vector<8x64xf32> -> vector<8x64xf32>
    %cst_17 = arith.constant dense<0.000000e+00> : vector<8x64xf32>
    %29 = tpu.matmul %21, %25, %cst_17 {dimension_numbers = #tpu.dot_dimension_numbers<[1], [0], [0], [1], [0, 0, 1, 1], [], []>} : vector<8x32xf32>, vector<32x64xf32>, vector<8x64xf32> -> vector<8x64xf32>
    %30 = arith.negf %28 : vector<8x64xf32>
    %31 = math.exp %30 : vector<8x64xf32>
    %cst_18 = arith.constant 1.000000e+00 : f32
    %32 = vector.broadcast %cst_18 : f32 to vector<8x64xf32>
    %33 = arith.addf %32, %31 : vector<8x64xf32>
    %34 = arith.divf %32, %33 : vector<8x64xf32>
    %35 = arith.mulf %28, %34 : vector<8x64xf32>
    %36 = arith.mulf %35, %29 : vector<8x64xf32>
    %cst_19 = arith.constant dense<0.000000e+00> : vector<8x32xf32>
    %37 = tpu.matmul %36, %27, %cst_19 {dimension_numbers = #tpu.dot_dimension_numbers<[1], [0], [0], [1], [0, 0, 1, 1], [], []>} : vector<8x64xf32>, vector<64x32xf32>, vector<8x32xf32> -> vector<8x32xf32>
    %cst_20 = arith.constant 1.000000e+00 : f32
    %38 = vector.broadcast %cst_20 : f32 to vector<8x32xf32>
    %39 = arith.mulf %37, %38 : vector<8x32xf32>
    %c0_21 = arith.constant 0 : index
    %c0_22 = arith.constant 0 : index
    %40 = vector.load %arg9[%c0_21, %c0_22] : memref<32x3xf32, #tpu.memory_space<vmem>>, vector<32x3xf32>
    %cst_23 = arith.constant dense<0.000000e+00> : vector<8x3xf32>
    %41 = tpu.matmul %21, %40, %cst_23 {dimension_numbers = #tpu.dot_dimension_numbers<[1], [0], [0], [1], [0, 0, 1, 1], [], []>} : vector<8x32xf32>, vector<32x3xf32>, vector<8x3xf32> -> vector<8x3xf32>
    %c0_24 = arith.constant 0 : index
    %c0_25 = arith.constant 0 : index
    %42 = vector.load %arg10[%c0_24, %c0_25] : memref<1x3xf32, #tpu.memory_space<vmem>>, vector<1x3xf32>
    %43 = vector.broadcast %42 : vector<1x3xf32> to vector<8x3xf32>
    %44 = arith.addf %41, %43 : vector<8x3xf32>
    %45 = arith.negf %44 : vector<8x3xf32>
    %46 = math.exp %45 : vector<8x3xf32>
    %cst_26 = arith.constant 1.000000e+00 : f32
    %47 = vector.broadcast %cst_26 : f32 to vector<8x3xf32>
    %48 = arith.addf %47, %46 : vector<8x3xf32>
    %49 = arith.divf %47, %48 : vector<8x3xf32>
    %50 = vector.extract_strided_slice %49 {offsets = [0, 0], sizes = [8, 1], strides = [1, 1]} : vector<8x3xf32> to vector<8x1xf32>
    %cst_27 = arith.constant 0.000000e+00 : f32
    %51 = vector.broadcast %cst_27 : f32 to vector<8x1xf32>
    %52 = vector.extract_strided_slice %49 {offsets = [0, 1], sizes = [8, 1], strides = [1, 1]} : vector<8x3xf32> to vector<8x1xf32>
    %53 = arith.cmpf ogt, %52, %50 : vector<8x1xf32>
    %54 = arith.extui %53 : vector<8x1xi1> to vector<8x1xi32>
    %55 = arith.sitofp %54 : vector<8x1xi32> to vector<8x1xf32>
    %56 = arith.addf %51, %55 : vector<8x1xf32>
    %57 = vector.extract_strided_slice %49 {offsets = [0, 2], sizes = [8, 1], strides = [1, 1]} : vector<8x3xf32> to vector<8x1xf32>
    %58 = arith.cmpf ogt, %57, %50 : vector<8x1xf32>
    %59 = arith.extui %58 : vector<8x1xi1> to vector<8x1xi32>
    %60 = arith.sitofp %59 : vector<8x1xi32> to vector<8x1xf32>
    %61 = arith.addf %56, %60 : vector<8x1xf32>
    %cst_28 = arith.constant 2.000000e+00 : f32
    %62 = vector.broadcast %cst_28 : f32 to vector<8x1xf32>
    %63 = arith.cmpf olt, %61, %62 : vector<8x1xf32>
    %cst_29 = arith.constant 0.000000e+00 : f32
    %64 = vector.broadcast %cst_29 : f32 to vector<8x1xf32>
    %65 = arith.select %63, %50, %64 : vector<8x1xi1>, vector<8x1xf32>
    %66 = vector.extract_strided_slice %49 {offsets = [0, 1], sizes = [8, 1], strides = [1, 1]} : vector<8x3xf32> to vector<8x1xf32>
    %cst_30 = arith.constant 0.000000e+00 : f32
    %67 = vector.broadcast %cst_30 : f32 to vector<8x1xf32>
    %68 = vector.extract_strided_slice %49 {offsets = [0, 0], sizes = [8, 1], strides = [1, 1]} : vector<8x3xf32> to vector<8x1xf32>
    %69 = arith.cmpf oge, %68, %66 : vector<8x1xf32>
    %70 = arith.extui %69 : vector<8x1xi1> to vector<8x1xi32>
    %71 = arith.sitofp %70 : vector<8x1xi32> to vector<8x1xf32>
    %72 = arith.addf %67, %71 : vector<8x1xf32>
    %73 = vector.extract_strided_slice %49 {offsets = [0, 2], sizes = [8, 1], strides = [1, 1]} : vector<8x3xf32> to vector<8x1xf32>
    %74 = arith.cmpf ogt, %73, %66 : vector<8x1xf32>
    %75 = arith.extui %74 : vector<8x1xi1> to vector<8x1xi32>
    %76 = arith.sitofp %75 : vector<8x1xi32> to vector<8x1xf32>
    %77 = arith.addf %72, %76 : vector<8x1xf32>
    %cst_31 = arith.constant 2.000000e+00 : f32
    %78 = vector.broadcast %cst_31 : f32 to vector<8x1xf32>
    %79 = arith.cmpf olt, %77, %78 : vector<8x1xf32>
    %cst_32 = arith.constant 0.000000e+00 : f32
    %80 = vector.broadcast %cst_32 : f32 to vector<8x1xf32>
    %81 = arith.select %79, %66, %80 : vector<8x1xi1>, vector<8x1xf32>
    %82 = vector.extract_strided_slice %49 {offsets = [0, 2], sizes = [8, 1], strides = [1, 1]} : vector<8x3xf32> to vector<8x1xf32>
    %cst_33 = arith.constant 0.000000e+00 : f32
    %83 = vector.broadcast %cst_33 : f32 to vector<8x1xf32>
    %84 = vector.extract_strided_slice %49 {offsets = [0, 0], sizes = [8, 1], strides = [1, 1]} : vector<8x3xf32> to vector<8x1xf32>
    %85 = arith.cmpf oge, %84, %82 : vector<8x1xf32>
    %86 = arith.extui %85 : vector<8x1xi1> to vector<8x1xi32>
    %87 = arith.sitofp %86 : vector<8x1xi32> to vector<8x1xf32>
    %88 = arith.addf %83, %87 : vector<8x1xf32>
    %89 = vector.extract_strided_slice %49 {offsets = [0, 1], sizes = [8, 1], strides = [1, 1]} : vector<8x3xf32> to vector<8x1xf32>
    %90 = arith.cmpf oge, %89, %82 : vector<8x1xf32>
    %91 = arith.extui %90 : vector<8x1xi1> to vector<8x1xi32>
    %92 = arith.sitofp %91 : vector<8x1xi32> to vector<8x1xf32>
    %93 = arith.addf %88, %92 : vector<8x1xf32>
    %cst_34 = arith.constant 2.000000e+00 : f32
    %94 = vector.broadcast %cst_34 : f32 to vector<8x1xf32>
    %95 = arith.cmpf olt, %93, %94 : vector<8x1xf32>
    %cst_35 = arith.constant 0.000000e+00 : f32
    %96 = vector.broadcast %cst_35 : f32 to vector<8x1xf32>
    %97 = arith.select %95, %82, %96 : vector<8x1xi1>, vector<8x1xf32>
    %98 = arith.addf %65, %81 : vector<8x1xf32>
    %99 = arith.addf %98, %97 : vector<8x1xf32>
    %cst_36 = arith.constant 1.000000e+00 : f32
    %100 = vector.broadcast %cst_36 : f32 to vector<8x1xf32>
    %101 = arith.divf %100, %99 : vector<8x1xf32>
    %102 = arith.addf %0, %39 : vector<8x32xf32>
    %103 = arith.mulf %65, %101 : vector<8x1xf32>
    %c0_37 = arith.constant 0 : index
    %c0_38 = arith.constant 0 : index
    %c0_39 = arith.constant 0 : index
    %104 = vector.load %arg6[%c0_37, %c0_38, %c0_39] : memref<3x32x64xf32, #tpu.memory_space<vmem>>, vector<1x32x64xf32>
    %105 = vector.shape_cast %104 : vector<1x32x64xf32> to vector<32x64xf32>
    %c0_40 = arith.constant 0 : index
    %c0_41 = arith.constant 0 : index
    %c0_42 = arith.constant 0 : index
    %106 = vector.load %arg7[%c0_40, %c0_41, %c0_42] : memref<3x32x64xf32, #tpu.memory_space<vmem>>, vector<1x32x64xf32>
    %107 = vector.shape_cast %106 : vector<1x32x64xf32> to vector<32x64xf32>
    %c0_43 = arith.constant 0 : index
    %c0_44 = arith.constant 0 : index
    %c0_45 = arith.constant 0 : index
    %108 = vector.load %arg8[%c0_43, %c0_44, %c0_45] : memref<3x64x32xf32, #tpu.memory_space<vmem>>, vector<1x64x32xf32>
    %109 = vector.shape_cast %108 : vector<1x64x32xf32> to vector<64x32xf32>
    %cst_46 = arith.constant dense<0.000000e+00> : vector<8x64xf32>
    %110 = tpu.matmul %21, %105, %cst_46 {dimension_numbers = #tpu.dot_dimension_numbers<[1], [0], [0], [1], [0, 0, 1, 1], [], []>} : vector<8x32xf32>, vector<32x64xf32>, vector<8x64xf32> -> vector<8x64xf32>
    %cst_47 = arith.constant dense<0.000000e+00> : vector<8x64xf32>
    %111 = tpu.matmul %21, %107, %cst_47 {dimension_numbers = #tpu.dot_dimension_numbers<[1], [0], [0], [1], [0, 0, 1, 1], [], []>} : vector<8x32xf32>, vector<32x64xf32>, vector<8x64xf32> -> vector<8x64xf32>
    %112 = arith.negf %110 : vector<8x64xf32>
    %113 = math.exp %112 : vector<8x64xf32>
    %cst_48 = arith.constant 1.000000e+00 : f32
    %114 = vector.broadcast %cst_48 : f32 to vector<8x64xf32>
    %115 = arith.addf %114, %113 : vector<8x64xf32>
    %116 = arith.divf %114, %115 : vector<8x64xf32>
    %117 = arith.mulf %110, %116 : vector<8x64xf32>
    %118 = arith.mulf %117, %111 : vector<8x64xf32>
    %cst_49 = arith.constant dense<0.000000e+00> : vector<8x32xf32>
    %119 = tpu.matmul %118, %109, %cst_49 {dimension_numbers = #tpu.dot_dimension_numbers<[1], [0], [0], [1], [0, 0, 1, 1], [], []>} : vector<8x64xf32>, vector<64x32xf32>, vector<8x32xf32> -> vector<8x32xf32>
    %120 = vector.broadcast %103 : vector<8x1xf32> to vector<8x32xf32>
    %121 = arith.mulf %119, %120 : vector<8x32xf32>
    %122 = arith.addf %102, %121 : vector<8x32xf32>
    %123 = arith.mulf %81, %101 : vector<8x1xf32>
    %c1 = arith.constant 1 : index
    %c0_50 = arith.constant 0 : index
    %c0_51 = arith.constant 0 : index
    %124 = vector.load %arg6[%c1, %c0_50, %c0_51] : memref<3x32x64xf32, #tpu.memory_space<vmem>>, vector<1x32x64xf32>
    %125 = vector.shape_cast %124 : vector<1x32x64xf32> to vector<32x64xf32>
    %c1_52 = arith.constant 1 : index
    %c0_53 = arith.constant 0 : index
    %c0_54 = arith.constant 0 : index
    %126 = vector.load %arg7[%c1_52, %c0_53, %c0_54] : memref<3x32x64xf32, #tpu.memory_space<vmem>>, vector<1x32x64xf32>
    %127 = vector.shape_cast %126 : vector<1x32x64xf32> to vector<32x64xf32>
    %c1_55 = arith.constant 1 : index
    %c0_56 = arith.constant 0 : index
    %c0_57 = arith.constant 0 : index
    %128 = vector.load %arg8[%c1_55, %c0_56, %c0_57] : memref<3x64x32xf32, #tpu.memory_space<vmem>>, vector<1x64x32xf32>
    %129 = vector.shape_cast %128 : vector<1x64x32xf32> to vector<64x32xf32>
    %cst_58 = arith.constant dense<0.000000e+00> : vector<8x64xf32>
    %130 = tpu.matmul %21, %125, %cst_58 {dimension_numbers = #tpu.dot_dimension_numbers<[1], [0], [0], [1], [0, 0, 1, 1], [], []>} : vector<8x32xf32>, vector<32x64xf32>, vector<8x64xf32> -> vector<8x64xf32>
    %cst_59 = arith.constant dense<0.000000e+00> : vector<8x64xf32>
    %131 = tpu.matmul %21, %127, %cst_59 {dimension_numbers = #tpu.dot_dimension_numbers<[1], [0], [0], [1], [0, 0, 1, 1], [], []>} : vector<8x32xf32>, vector<32x64xf32>, vector<8x64xf32> -> vector<8x64xf32>
    %132 = arith.negf %130 : vector<8x64xf32>
    %133 = math.exp %132 : vector<8x64xf32>
    %cst_60 = arith.constant 1.000000e+00 : f32
    %134 = vector.broadcast %cst_60 : f32 to vector<8x64xf32>
    %135 = arith.addf %134, %133 : vector<8x64xf32>
    %136 = arith.divf %134, %135 : vector<8x64xf32>
    %137 = arith.mulf %130, %136 : vector<8x64xf32>
    %138 = arith.mulf %137, %131 : vector<8x64xf32>
    %cst_61 = arith.constant dense<0.000000e+00> : vector<8x32xf32>
    %139 = tpu.matmul %138, %129, %cst_61 {dimension_numbers = #tpu.dot_dimension_numbers<[1], [0], [0], [1], [0, 0, 1, 1], [], []>} : vector<8x64xf32>, vector<64x32xf32>, vector<8x32xf32> -> vector<8x32xf32>
    %140 = vector.broadcast %123 : vector<8x1xf32> to vector<8x32xf32>
    %141 = arith.mulf %139, %140 : vector<8x32xf32>
    %142 = arith.addf %122, %141 : vector<8x32xf32>
    %143 = arith.mulf %97, %101 : vector<8x1xf32>
    %c2 = arith.constant 2 : index
    %c0_62 = arith.constant 0 : index
    %c0_63 = arith.constant 0 : index
    %144 = vector.load %arg6[%c2, %c0_62, %c0_63] : memref<3x32x64xf32, #tpu.memory_space<vmem>>, vector<1x32x64xf32>
    %145 = vector.shape_cast %144 : vector<1x32x64xf32> to vector<32x64xf32>
    %c2_64 = arith.constant 2 : index
    %c0_65 = arith.constant 0 : index
    %c0_66 = arith.constant 0 : index
    %146 = vector.load %arg7[%c2_64, %c0_65, %c0_66] : memref<3x32x64xf32, #tpu.memory_space<vmem>>, vector<1x32x64xf32>
    %147 = vector.shape_cast %146 : vector<1x32x64xf32> to vector<32x64xf32>
    %c2_67 = arith.constant 2 : index
    %c0_68 = arith.constant 0 : index
    %c0_69 = arith.constant 0 : index
    %148 = vector.load %arg8[%c2_67, %c0_68, %c0_69] : memref<3x64x32xf32, #tpu.memory_space<vmem>>, vector<1x64x32xf32>
    %149 = vector.shape_cast %148 : vector<1x64x32xf32> to vector<64x32xf32>
    %cst_70 = arith.constant dense<0.000000e+00> : vector<8x64xf32>
    %150 = tpu.matmul %21, %145, %cst_70 {dimension_numbers = #tpu.dot_dimension_numbers<[1], [0], [0], [1], [0, 0, 1, 1], [], []>} : vector<8x32xf32>, vector<32x64xf32>, vector<8x64xf32> -> vector<8x64xf32>
    %cst_71 = arith.constant dense<0.000000e+00> : vector<8x64xf32>
    %151 = tpu.matmul %21, %147, %cst_71 {dimension_numbers = #tpu.dot_dimension_numbers<[1], [0], [0], [1], [0, 0, 1, 1], [], []>} : vector<8x32xf32>, vector<32x64xf32>, vector<8x64xf32> -> vector<8x64xf32>
    %152 = arith.negf %150 : vector<8x64xf32>
    %153 = math.exp %152 : vector<8x64xf32>
    %cst_72 = arith.constant 1.000000e+00 : f32
    %154 = vector.broadcast %cst_72 : f32 to vector<8x64xf32>
    %155 = arith.addf %154, %153 : vector<8x64xf32>
    %156 = arith.divf %154, %155 : vector<8x64xf32>
    %157 = arith.mulf %150, %156 : vector<8x64xf32>
    %158 = arith.mulf %157, %151 : vector<8x64xf32>
    %cst_73 = arith.constant dense<0.000000e+00> : vector<8x32xf32>
    %159 = tpu.matmul %158, %149, %cst_73 {dimension_numbers = #tpu.dot_dimension_numbers<[1], [0], [0], [1], [0, 0, 1, 1], [], []>} : vector<8x64xf32>, vector<64x32xf32>, vector<8x32xf32> -> vector<8x32xf32>
    %160 = vector.broadcast %143 : vector<8x1xf32> to vector<8x32xf32>
    %161 = arith.mulf %159, %160 : vector<8x32xf32>
    %162 = arith.addf %142, %161 : vector<8x32xf32>
    %c0_74 = arith.constant 0 : index
    %c0_75 = arith.constant 0 : index
    %163 = vector.load %arg11[%c0_74, %c0_75] : memref<8x32xf32, #tpu.memory_space<vmem>>, vector<8x32xf32>
    tpu.vector_store %arg11[%c0_74, %c0_75], %162 {strides = array<i32>} : memref<8x32xf32, #tpu.memory_space<vmem>>, vector<8x32xf32>,
    return
  }
  func.func @transform_0(%arg0: i32) -> (i32, i32) {
    %c0_i32 = arith.constant 0 : i32
    %c0_i32_0 = arith.constant 0 : i32
    return %arg0, %c0_i32 : i32, i32
  }
  func.func @transform_1(%arg0: i32) -> (i32, i32) {
    %c0_i32 = arith.constant 0 : i32
    %c0_i32_0 = arith.constant 0 : i32
    %c0_i32_1 = arith.constant 0 : i32
    return %c0_i32, %c0_i32_0 : i32, i32
  }
  func.func @transform_2(%arg0: i32) -> (i32, i32, i32) {
    %c0_i32 = arith.constant 0 : i32
    %c0_i32_0 = arith.constant 0 : i32
    %c0_i32_1 = arith.constant 0 : i32
    %c0_i32_2 = arith.constant 0 : i32
    return %c0_i32, %c0_i32_0, %c0_i32_1 : i32, i32, i32
  }
  func.func @transform_3(%arg0: i32) -> (i32, i32, i32) {
    %c0_i32 = arith.constant 0 : i32
    %c0_i32_0 = arith.constant 0 : i32
    %c0_i32_1 = arith.constant 0 : i32
    %c0_i32_2 = arith.constant 0 : i32
    return %c0_i32, %c0_i32_0, %c0_i32_1 : i32, i32, i32
  }
  func.func @transform_4(%arg0: i32) -> (i32, i32, i32) {
    %c0_i32 = arith.constant 0 : i32
    %c0_i32_0 = arith.constant 0 : i32
    %c0_i32_1 = arith.constant 0 : i32
    %c0_i32_2 = arith.constant 0 : i32
    return %c0_i32, %c0_i32_0, %c0_i32_1 : i32, i32, i32
  }
  func.func @transform_5(%arg0: i32) -> (i32, i32, i32) {
    %c0_i32 = arith.constant 0 : i32
    %c0_i32_0 = arith.constant 0 : i32
    %c0_i32_1 = arith.constant 0 : i32
    %c0_i32_2 = arith.constant 0 : i32
    return %c0_i32, %c0_i32_0, %c0_i32_1 : i32, i32, i32
  }
  func.func @transform_6(%arg0: i32) -> (i32, i32, i32) {
    %c0_i32 = arith.constant 0 : i32
    %c0_i32_0 = arith.constant 0 : i32
    %c0_i32_1 = arith.constant 0 : i32
    %c0_i32_2 = arith.constant 0 : i32
    return %c0_i32, %c0_i32_0, %c0_i32_1 : i32, i32, i32
  }
  func.func @transform_7(%arg0: i32) -> (i32, i32, i32) {
    %c0_i32 = arith.constant 0 : i32
    %c0_i32_0 = arith.constant 0 : i32
    %c0_i32_1 = arith.constant 0 : i32
    %c0_i32_2 = arith.constant 0 : i32
    return %c0_i32, %c0_i32_0, %c0_i32_1 : i32, i32, i32
  }
  func.func @transform_8(%arg0: i32) -> (i32, i32) {
    %c0_i32 = arith.constant 0 : i32
    %c0_i32_0 = arith.constant 0 : i32
    %c0_i32_1 = arith.constant 0 : i32
    return %c0_i32, %c0_i32_0 : i32, i32
  }
  func.func @transform_9(%arg0: i32) -> (i32, i32) {
    %c0_i32 = arith.constant 0 : i32
    %c0_i32_0 = arith.constant 0 : i32
    %c0_i32_1 = arith.constant 0 : i32
    return %c0_i32, %c0_i32_0 : i32, i32
  }
  func.func @transform_10(%arg0: i32) -> (i32, i32) {
    %c0_i32 = arith.constant 0 : i32
    %c0_i32_0 = arith.constant 0 : i32
    return %arg0, %c0_i32 : i32, i32
  }
}

</mosaic_0001>

<bundles_post_ra>
// kernel: deepseek_forward.9
= control target key start
LH: loop header
LB: loop body
LE: loop exit
PB: predicated region body
PF: predicated region fallthrough
CT: control target
= control target key end

     0   :  { %8 = vsyncpa [#allocation3], 0  ;;  %s626_s0 = inlined_call_operand.vmem [shape: f32[16,32], index: 0, kind: input, shape index: {}]   ;;  %s627_s1 = inlined_call_operand.vmem [shape: f32[1,32], index: 1, kind: input, shape index: {}]   ;;  %s628_s2 = inlined_call_operand.vmem [shape: f32[32,64], index: 2, kind: input, shape index: {}]   ;;  %s629_s3 = inlined_call_operand.hbm [shape: f32[16,64], index: 3, kind: output, shape index: {}]  }
   0x1   :  { %10 = vsyncpa [#allocation3 + $0x1], 0  ;;  %s508_s12 = smov 0   ;;  %s510_s13 = smov 0  }
   0x2   :  { %s512_s14 = smov 0   ;;  %s514_s15 = smov 0  }
   0x3 LB: > { %s529_s16 = sadd.s32 4294967295, %s482_s15   ;;  %s342_s17 = sadd.s32 4294967294, %s482_s15   ;;  %s482_s15 = sphi %s514_s15, %s635_s15   ;;  %s478_s14 = sphi %s512_s14, %s634_s14   ;;  %s474_s13 = sphi %s510_s13, %s633_s13   ;;  %s470_s12 = sphi %s508_s12, %s632_s12  }
   0x4   : > { %s533_s18 = sadd.s32 1, %s482_s15   ;;  %s91_s19 = sadd.s32 1, %s478_s14 }
   0x5   : > { %s88_s20 = ssub.s32 %s482_s15, %s533_s18  ;;  %p101_p0 = scmp.ne.s32.totalorder %s478_s14, %s474_s13 }
   0x6   : > { %p89_p1 = scmp.eq.s32.totalorder %s88_s20, 0  ;;  %p102_p2 = scmp.eq.s32.totalorder %s529_s16, 1 }
   0x7   : > { %p107_p3 = scmp.ne.s32.totalorder %s474_s13, %s470_s12  ;;  %p108_p4 = scmp.eq.s32.totalorder %s342_s17, 1 }
   0x8   : > { %s544_s21 = scalar_select %p89_p1, %s478_s14, %s91_s19  }
   0x9   : > { %p546_p5 = por %p102_p2, %p101_p0  ;;  %p550_p6 = por %p108_p4, %p107_p3 }
   0xa   : > { %p345_p7 = scmp.ge.s32.totalorder %s482_s15, 1  ;;  %p139_p8 = scmp.lt.s32.totalorder %s482_s15, 3 }
   0xc   : > { %p140_p9 = pnand %p345_p7, %p139_p8 }
   0xd   : > { %p162_p10 = scmp.lt.s32.totalorder (!%p140_p9), %s529_s16, 1  ;;  %vm168_vm0 = vcmask (!%p140_p9), 261120   ;;  %v190_v7 = vld [vmem:[%s628_s2] sm:$0xff] (!%p140_p9)  ;;  %v191_v8 = vld [vmem:[%s628_s2 + $0x8] sm:$0xff] (!%p140_p9)  ;;  %v192_v9 = vld [vmem:[%s628_s2 + $0x10] sm:$0xff] (!%p140_p9)  ;;  %v484_v10 = vmov (!%p140_p9), 0.0|0.0  }
   0xe   : > { %143 = sbr.rel (%p140_p9) target bundleno = 563 (0x233), region = 32  ;;  %370 = vmatprep.subr.bf16.mxu0 (!%p140_p9), %v484_v10  ;;  %v371_v11 = vpack.c.bf16 (!%p140_p9), %v191_v8, %v190_v7  ;;  %v193_v12 = vld [vmem:[%s628_s2 + $0x18] sm:$0xff] (!%p140_p9)  ;;  %vm485_vm1 = vmmov (!%p140_p9), 0   ;;  %v486_v13 = vmov (!%p140_p9), 0.0   ;;  %v348_v19 = vld [vmem:[%s627_s1] ss:$0 sm:$0xff] (!%p140_p9) }
   0xf   : > { %367 = vmatprep.mubr.msk.f32.mxu0 (!%p140_p9), %vm485_vm1, %v486_v13  ;;  %v374_v14 = vpack.c.bf16 (!%p140_p9), %v193_v12, %v192_v9  ;;  %s159_s17 = sand.u32 (!%p140_p9), 1, %s474_s13   ;;  %s351_s20 = sshll.u32 (!%p140_p9), %s529_s16, 7  ;;  %vm267_vm2 = vcmask (!%p140_p9), 523264  }
  0x10   : > { %372 = vmatpush3.bf16.msra.mxu0 (!%p140_p9), %v371_v11  ;;  %s346_s19 = sshll.u32 (!%p140_p9), %s159_s17, 3  ;;  %s270_s29 = scalar_lea.sflag (!%p140_p9), [#allocation3], %s159_s17 }
  0x11   : > { %373 = vmatprep.subr.bf16.mxu0 (!%p140_p9), %v484_v10 }
  0x14   : > { %375 = vmatpush3.bf16.msra.mxu0 (!%p140_p9), %v374_v14 }
  0x15   : > { %s163_s24 = scalar_select %p162_p10, %s529_s16, 1 }
  0x16   : > { %s487_s16 = smov [#allocation2]  }
  0x17   : > { %s347_s25 = sshll.u32 %s163_s24, 3  ;;  %s161_s24 = scalar_lea.vmem [#allocation2], %s346_s19 }
  0x18   : > { %s165_s28 = scalar_lea.vmem %s626_s0, %s347_s25  ;;  %s283_s25 = sshll.u32 %s161_s24, 4  ;;  %s586_s25 = int_to_ptr.vmem [resolvable:$true] %s283_s25 }
  0x19   : > { %v166_v0 = vld [vmem:[%s165_s28] sm:$0xff]  ;;  %s584_s28 = scalar_lea.hbm %s629_s3, %s351_s20  ;;  %s420_s30 = scalar_lea.vmem %s586_s25, 128 }
  0x1a   : > { %v169_v1 = vsel %vm168_vm0, %v166_v0, 0.0  ;;  %p421_p11 = scmp.ne.s32.totalorder %s586_s25, %s420_s30  ;;  %s424_s4 = sshll.u32 %s487_s16, 4  ;;  %s425_s4 = int_to_ptr.vmem [resolvable:$false] %s424_s4 }
  0x1b   : > { %170 = vadd.xlane.f32.xlu0 %v169_v1  ;;  %s426_s5 = scalar_lea.vmem %s425_s4, 256  ;;  %p427_p0 = scmp.lt.s32.totalorder %s586_s25, %s425_s4 }
  0x1c   : > { %p422_p12 = pnand %p421_p11, %p546_p5  ;;  %p428_p1 = scmp.lt.s32.totalorder %s426_s5, %s420_s30 }
  0x1e   : > { %p423_p13 = pneg %p422_p12  ;;  %p429_p2 = por %p428_p1, %p427_p0 }
  0x20   : > { %p430_p3 = pnand %p429_p2, %p423_p13 }
  0xa8   : > { %v171_v2 = vpop.xlane.xlu0 %170 }
  0xa9   : > { %v173_v3 = vmul.f32 0.03125, %v171_v2 }
  0xab   : > { %v174_v4 = vsub.f32 %v166_v0, %v173_v3 }
  0xad   : > { %v175_v5 = vmul.f32 %v174_v4, %v174_v4 }
  0xaf   : > { %v176_v6 = vsel %vm168_vm0, %v175_v5, 0.0 }
  0xb0   : > { %177 = vadd.xlane.f32.xlu0 %v176_v6 }
 0x13d   : > { %v178_v15 = vpop.xlane.xlu0 %177 }
 0x13e   : > { %v179_v16 = vmul.f32 0.03125, %v178_v15 }
 0x140   : > { %v180_v17 = vadd.f32 1e-05, %v179_v16 }
 0x142   : > { %418 = vrsqrt.f32 %v180_v17 }
 0x14c   : > { %v419_v18 = vpop.eup %418 }
 0x14d   : > { %v182_v20 = vmul.f32 %v419_v18, %v174_v4 }
 0x14f   : > { %v189_v21 = vmul.f32 %v348_v19, %v182_v20 }
 0x151   : > { %368 = vmatmul.mubr.msk.f32.vlgmr.msra.gmra.mrb[0].mxu0 %vm168_vm0, %v189_v21 }
 0x224   : > { %v263_v22 = vpop.f32.mrb[0].mxu0 }
 0x225   : > { %268 = vst.msk [vmem:[%s161_s24] sm:$0xff] %vm267_vm2, %v263_v22  ;;  %v369_v23 = vpop.f32.mrb[1].mxu0 }
 0x226   : > { %433 = shalt.err (!%p430_p3)
}
 0x227   : > { %s434_s6 = scalar_lea.hbm %s584_s28, 128  ;;  %s438_s9 = scalar_lea.hbm %s629_s3, 256 }
 0x228   : > { %p435_p4 = scmp.ne.s32.totalorder %s584_s28, %s434_s6  ;;  %p439_p9 = scmp.lt.u32.totalorder %s584_s28, %s629_s3 }
 0x229   : > { %p440_p10 = scmp.lt.u32.totalorder %s438_s9, %s434_s6  ;;  %p442_p12 = scmp.lt.u32.totalorder %s434_s6, %s584_s28 }
 0x22a   : > { %p436_p7 = pnand %p435_p4, %p546_p5 }
 0x22b   : > { %p441_p11 = por %p440_p10, %p439_p9 }
 0x22c   : > { %p437_p8 = pneg %p436_p7 }
 0x22d   : > { %p443_p13 = por %p442_p12, %p441_p11 }
 0x22f   : > { %p444_p0 = pnand %p443_p13, %p437_p8 }
 0x231   : > { %447 = shalt.err (!%p444_p0)
}
 0x232   : > { %376 = dma.vmem_to_hbm [thread:$0]  (%p546_p5), %s586_s25, 128, %s584_s28, %s270_s29  }
 0x233 PF: > { %p382_p1 = scmp.ge.s32.totalorder %s482_s15, 2  ;;  %s295_s17 = sand.u32 1, %s470_s12  }
 0x234   : > { %s296_s19 = scalar_lea.sflag [#allocation3], %s295_s17 }
 0x235   : > { %p379_p2 = pnand %p382_p1, %p550_p6 }
 0x237   : > { %465 = dma.done.wait (!%p379_p2), %s296_s19, 128  }
 0x238   : > { %467 = vsyncadd (!%p379_p2), %s296_s19, 4294967168  ;;  %p13_p3 = scmp.ge.s32.totalorder %s533_s18, 4   ;;  %s632_s12 = smov %s474_s13 }
 0x239   : > { %s633_s13 = smov %s478_s14  ;;  %s634_s14 = smov %s544_s21 }
 0x23a   : > { %s635_s15 = smov %s533_s18  ;;  %15 = sbr.rel (!%p13_p3) target bundleno = 3 (0x3), region = 67 }
 0x241   :  { %301 = vsyncpa [#allocation3], 1 }
 0x242   :  { %303 = vsyncpa [#allocation3 + $0x1], 1 }

// kernel: deepseek_forward.5
= control target key start
LH: loop header
LB: loop body
LE: loop exit
PB: predicated region body
PF: predicated region fallthrough
CT: control target
= control target key end

     0   :  { %s1726_s30 = smov 0   ;;  %s1883_s0 = inlined_call_operand.vmem [shape: f32[16,32], index: 0, kind: input, shape index: {}]   ;;  %s1884_s1 = inlined_call_operand.vmem [shape: f32[1,32], index: 1, kind: input, shape index: {}]   ;;  %s1885_s2 = inlined_call_operand.vmem [shape: f32[32,48], index: 2, kind: input, shape index: {}]   ;;  %s1886_s3 = inlined_call_operand.vmem [shape: f32[16,64], index: 3, kind: input, shape index: {}]   ;;  %s1887_s4 = inlined_call_operand.vmem [shape: f32[16,48], index: 4, kind: input, shape index: {}]   ;;  %s1888_s5 = inlined_call_operand.vmem [shape: f32[32,32], index: 5, kind: input, shape index: {}]   ;;  %s1889_s6 = inlined_call_operand.vmem [shape: f32[8,16], index: 6, kind: input, shape index: {}]   ;;  %s1890_s7 = inlined_call_operand.vmem [shape: f32[8,16], index: 7, kind: input, shape index: {}]   ;;  %s1891_s8 = inlined_call_operand.vmem [shape: f32[16,16], index: 8, kind: input, shape index: {}]   ;;  %s1892_s9 = inlined_call_operand.vmem [shape: f32[16,32], index: 9, kind: output, shape index: {}]  }
   0x1 LB: > { %s1457_s10 = sadd.s32 4294967295, %s1664_s30   ;;  %p1461_p0 = scmp.ge.s32.totalorder %s1664_s30, 1  ;;  %s1664_s30 = sphi %s1726_s30, %s19_s30  }
   0x2   : > { %p286_p1 = scmp.lt.s32.totalorder %s1664_s30, 3 }
   0x4   : > { %p287_p2 = pnand %p1461_p0, %p286_p1 }
   0x5   : > { %p320_p3 = scmp.lt.s32.totalorder (!%p287_p2), %s1457_s10, 1  ;;  %vm330_vm0 = vcmask (!%p287_p2), 261120   ;;  %v352_v7 = vld [vmem:[%s1885_s2] sm:$0xff] (!%p287_p2)  ;;  %v353_v8 = vld [vmem:[%s1885_s2 + $0x8] sm:$0xff] (!%p287_p2)  ;;  %v354_v9 = vld [vmem:[%s1885_s2 + $0x10] sm:$0xff] (!%p287_p2)  ;;  %v1666_v10 = vmov (!%p287_p2), 0.0|0.0   ;;  %v752_v61 = vlaneseq (!%p287_p2) }
   0x6   : > { %290 = sbr.rel (%p287_p2) target bundleno = 2925 (0xb6d), region = 56  ;;  %1602 = vmatprep.subr.bf16.mxu0 (!%p287_p2), %v1666_v10  ;;  %v1603_v11 = vpack.c.bf16 (!%p287_p2), %v353_v8, %v352_v7  ;;  %v355_v12 = vld [vmem:[%s1885_s2 + $0x18] sm:$0xff] (!%p287_p2)  ;;  %vm1667_vm1 = vmmov (!%p287_p2), 0   ;;  %v1668_v13 = vmov (!%p287_p2), 0.0   ;;  %1608 = vmatprep.subr.bf16.mxu1 (!%p287_p2), %v1666_v10  ;;  %v429_v15 = vld [vmem:[%s1886_s3] sm:$0xff] (!%p287_p2)  ;;  %v430_v16 = vld [vmem:[%s1886_s3 + $0x8] sm:$0xff] (!%p287_p2) }
   0x7   : > { %1527 = vmatprep.mubr.msk.f32.mxu0 (!%p287_p2), %vm1667_vm1, %v1668_v13  ;;  %1534 = vmatprep.mubr.msk.f32.mxu1 (!%p287_p2), %vm1667_vm1, %v1668_v13  ;;  %v1606_v14 = vpack.c.bf16 (!%p287_p2), %v355_v12, %v354_v9  ;;  %v1609_v17 = vpack.c.bf16 (!%p287_p2), %v430_v16, %v429_v15  ;;  %v1464_v22 = vld [vmem:[%s1884_s1] ss:$0 sm:$0xff] (!%p287_p2)  ;;  %v584_v26 = vld [vmem:[%s1891_s8 + $0x8] sm:$0xff] (!%p287_p2)  ;;  %vm431_vm2 = vcmask (!%p287_p2), 130048   ;;  %s1669_s19 = smov (!%p287_p2), 112   ;;  %s1670_s20 = smov (!%p287_p2), 96  }
   0x8   : > { %1604 = vmatpush3.bf16.msra.mxu0 (!%p287_p2), %v1603_v11  ;;  %v583_v25 = vld [vmem:[%s1891_s8] sm:$0xff] (!%p287_p2)  ;;  %v506_v29 = vld [vmem:[%s1887_s4 + $0x8] sm:$0xff] (!%p287_p2)  ;;  %s1671_s23 = smov (!%p287_p2), 32   ;;  %s1672_s26 = smov (!%p287_p2), 120   ;;  %vm769_vm3 = vcmask (!%p287_p2), 64512   ;;  %v753_v62 = vshrl.u32 (!%p287_p2), %v752_v61, 7 }
   0x9   : > { %1605 = vmatprep.subr.bf16.mxu0 (!%p287_p2), %v1666_v10  ;;  %1610 = vmatpush3.bf16.msra.mxu1 (!%p287_p2), %v1609_v17  ;;  %v1615_v27 = vpack.c.bf16 (!%p287_p2), %v584_v26, %v583_v25  ;;  %v505_v28 = vld [vmem:[%s1887_s4] sm:$0xff] (!%p287_p2)  ;;  %v755_v63 = vand.u32 (!%p287_p2), 127, %v752_v61  ;;  %s1673_s27 = smov (!%p287_p2), 104   ;;  %s1674_s28 = smov (!%p287_p2), 88  }
   0xa   : > { %1611 = vmatprep.subr.bf16.mxu1 (!%p287_p2), %v1666_v10  ;;  %v1612_v30 = vpack.c.bf16 (!%p287_p2), %v506_v29, %v505_v28  ;;  %v581_v33 = vld [vmem:[%s1889_s6] sm:$0xff] (!%p287_p2)  ;;  %s1675_s15 = smov (!%p287_p2), 80  }
   0xb   : > { %v582_v40 = vld [vmem:[%s1890_s7] sm:$0xff] (!%p287_p2)  ;;  %vm756_vm4 = vcmp.le.s32.totalorder (!%p287_p2), %v755_v63, %v753_v62 }
   0xc   : > { %1607 = vmatpush3.bf16.msra.mxu0 (!%p287_p2), %v1606_v14 }
   0xd   : > { %s1894_s10 = smov (!%p320_p3, %s1457_s10), 1  ;;  %1614 = vmatprep.subr.bf16.mxu0 %v1666_v10 }
   0xe   : > { %s1462_s11 = sshll.u32 %s1894_s10, 3 }
   0xf   : > { %s323_s14 = scalar_lea.vmem %s1883_s0, %s1462_s11  ;;  %s327_s22 = scalar_lea.vmem %s1892_s9, %s1462_s11 }
  0x10   : > { %v1742_v0 = vld [vmem:[%s323_s14] sm:$0xff] }
  0x11   : > { %v331_v1 = vsel %vm330_vm0, %v1742_v0, 0.0 }
  0x12   : > { %332 = vadd.xlane.f32.xlu0 %v331_v1 }
  0x9f   : > { %v333_v2 = vpop.xlane.xlu0 %332 }
  0xa0   : > { %v335_v3 = vmul.f32 0.03125, %v333_v2 }
  0xa2   : > { %v336_v4 = vsub.f32 %v1742_v0, %v335_v3 }
  0xa4   : > { %v337_v5 = vmul.f32 %v336_v4, %v336_v4 }
  0xa6   : > { %v338_v6 = vsel %vm330_vm0, %v337_v5, 0.0 }
  0xa7   : > { %339 = vadd.xlane.f32.xlu0 %v338_v6 }
 0x134   : > { %v340_v18 = vpop.xlane.xlu0 %339 }
 0x135   : > { %v341_v19 = vmul.f32 0.03125, %v340_v18 }
 0x137   : > { %v342_v20 = vadd.f32 1e-05, %v341_v19  ;;  %v757_v19 = vld [vmem:[%s1888_s5] sm:$0xff] }
 0x139   : > { %1648 = vrsqrt.f32 %v342_v20  ;;  %v758_v20 = vld [vmem:[%s1888_s5 + $0x8] sm:$0xff] }
 0x143   : > { %v1649_v21 = vpop.eup %1648 }
 0x144   : > { %v344_v23 = vmul.f32 %v1649_v21, %v336_v4  ;;  %v1624_v21 = vpack.c.bf16 %v758_v20, %v757_v19 }
 0x146   : > { %v351_v24 = vmul.f32 %v1464_v22, %v344_v23 }
 0x148   : > { %1528 = vmatmul.mubr.msk.f32.vlgmr.msra.gmra.mrb[0].mxu0 %vm330_vm0, %v351_v24 }
 0x149   : > { %1548 = vmatprep.mubr.msk.f32.mxu0 %vm1667_vm1, %v1668_v13  ;;  %1616 = vmatpush3.bf16.msra.mxu0 %v1615_v27 }
 0x14a   : > { %1558 = vmatprep.subr.mxu0 %v1668_v13 }
 0x21b   : > { %v425_v31 = vpop.f32.mrb[0].mxu0 }
 0x21c   : > { %507 = vrot.lane.b32.xlu1 %v425_v31, %s1669_s19  ;;  %v1529_v32 = vpop.f32.mrb[1].mxu0  ;;  %1535 = vmatmul.mubr.msk.f32.vlgmr.msra.gmra.mrb[0].mxu1 %vm431_vm2, %v425_v31 }
 0x21d   : > { %1613 = vmatpush3.bf16.msra.mxu1 %v1612_v30  ;;  %1541 = vmatprep.mubr.msk.f32.mxu1 %vm1667_vm1, %v1668_v13 }
 0x21e   : > { %1617 = vmatprep.subr.bf16.mxu1 %v1666_v10 }
 0x220   : > { %672 = vrot.lane.b32.xlu1 %v425_v31, %s1670_s20 }
 0x224   : > { %586 = vrot.lane.b32.xlu1 %v581_v33, %s1671_s23 }
 0x28e   : > { %v508_v34 = vpop.permute.xlu1 %507 }
 0x28f   : > { %1542 = vmatmul.mubr.msk.f32.vlgmr.msra.gmra.mrb[2].mxu1 %vm431_vm2, %v508_v34 }
 0x290   : > { %1619 = vmatpush3.bf16.msra.mxu1 %v1615_v27  ;;  %1555 = vmatprep.mubr.msk.f32.mxu1 %vm1667_vm1, %v1668_v13 }
 0x291   : > { %1568 = vmatprep.subr.mxu1 %v1668_v13 }
 0x292   : > { %v673_v35 = vpop.permute.xlu1 %672 }
 0x293   : > { %1556 = vmatmul.mubr.msk.f32.vlgmr.msra.gmra.mrb[4].mxu1 %vm431_vm2, %v673_v35 }
 0x294   : > { %1570 = vmatprep.mubr.msk.f32.mxu1 %vm1667_vm1, %v1668_v13 }
 0x296   : > { %v587_v48 = vpop.permute.xlu1 %586 }
 0x297   : > { %v671_v51 = vmul.f32 %v587_v48, %v425_v31 }
 0x2ef   : > { %v1809_v36 = vpop.f32.mrb[0].mxu1 }
 0x2f0   : > { %v1536_v37 = vpop.f32.mrb[1].mxu1 }
 0x362   : > { %v577_v38 = vpop.f32.mrb[2].mxu1 }
 0x363   : > { %591 = vrot.lane.b32.xlu0 %v577_v38, %s1670_s20  ;;  %v1543_v39 = vpop.f32.mrb[3].mxu1  ;;  %v762_v49 = vmul.f32 0.25, %v577_v38  ;;  %v589_v53 = vmul.f32 %v587_v48, %v577_v38 }
 0x364   : > { %v760_v39 = vld [vmem:[%s1888_s5 + $0x18] sm:$0xff] }
 0x366   : > { %v742_v41 = vpop.f32.mrb[4].mxu1 }
 0x367   : > { %v746_v42 = vmul.f32 %v742_v41, %v582_v40  ;;  %v1557_v43 = vpop.f32.mrb[5].mxu1 }
 0x369   : > { %748 = vrot.lane.b32.xlu1 %v746_v42, %s1671_s23 }
 0x3d5   : > { %v592_v44 = vpop.permute.xlu0 %591 }
 0x3d6   : > { %1549 = vmatmul.mubr.msk.f32.vlgmr.msra.gmra.mrb[2].mxu0 %vm431_vm2, %v592_v44 }
 0x3d7   : > { %1560 = vmatprep.mubr.msk.f32.mxu0 %vm1667_vm1, %v1668_v13 }
 0x3db   : > { %v749_v50 = vpop.permute.xlu1 %748 }
 0x3dc   : > { %v751_v52 = vadd.f32 %v749_v50, %v671_v51 }
 0x4a9   : > { %v661_v45 = vpop.f32.mrb[2].mxu0 }
 0x4aa   : > { %v665_v46 = vmul.f32 %v661_v45, %v582_v40  ;;  %v1550_v47 = vpop.f32.mrb[3].mxu0 }
 0x4ac   : > { %667 = vrot.lane.b32.xlu1 %v665_v46, %s1671_s23 }
 0x4b0   : > { %767 = vrot.lane.b32.xlu1 %v1809_v36, %s1672_s26 }
 0x4b4   : > { %764 = vrot.lane.b32.xlu1 %v762_v49, %s1672_s26 }
 0x4b8   : > { %848 = vrot.lane.b32.xlu1 %v751_v52, %s1670_s20 }
 0x51e   : > { %v668_v54 = vpop.permute.xlu1 %667 }
 0x51f   : > { %v670_v55 = vadd.f32 %v668_v54, %v589_v53 }
 0x521   : > { %v761_v56 = vmul.f32 0.25, %v670_v55 }
 0x522   : > { %v768_v57 = vpop.permute.xlu1 %767 }
 0x523   : > { %845 = vrot.lane.b32.xlu0 %v761_v56, %s1670_s20  ;;  %1559 = vmatpush3.xpose.msk.msra.mxu0 %vm769_vm3, %v768_v57 }
 0x524   : > { %1563 = vmatprep.subr.mxu0 %v1668_v13 }
 0x526   : > { %v765_v58 = vpop.permute.xlu1 %764 }
 0x527   : > { %1561 = vmatmul.mubr.msk.f32.vlgmr.msra.gmra.mrb[4].mxu0 %vm769_vm3, %v765_v58 }
 0x528   : > { %1565 = vmatprep.mubr.msk.f32.mxu0 %vm1667_vm1, %v1668_v13 }
 0x52a   : > { %v849_v59 = vpop.permute.xlu1 %848 }
 0x52b   : > { %1564 = vmatpush3.xpose.msk.msra.mxu0 %vm769_vm3, %v849_v59 }
 0x52c   : > { %1583 = vmatprep.subr.mxu0 %v1668_v13 }
 0x595   : > { %v846_v60 = vpop.permute.xlu0 %845 }
 0x596   : > { %1566 = vmatmul.mubr.msk.f32.vlgmr.msra.gmra.mrb[4].mxu0 %vm769_vm3, %v846_v60 }
 0x597   : > { %1585 = vmatprep.mubr.msk.f32.mxu0 %vm1667_vm1, %v1668_v13 }
 0x669   : > { %v920_v1 = vpop.f32.mrb[4].mxu0 }
 0x66a   : > { %v924_v2 = vsel %vm756_vm4, %v920_v1, -inf  ;;  %v1567_v3 = vpop.f32.mrb[5].mxu0 }
 0x66b   : > { %v925_v4 = vsel %vm769_vm3, %v924_v2, -inf }
 0x66c   : > { %926 = vmax.xlane.f32.xlu1 %v925_v4 }
 0x67d   : > { %1014 = vrot.lane.b32.xlu1 %v1809_v36, %s1673_s27 }
 0x681   : > { %1012 = vrot.lane.b32.xlu1 %v762_v49, %s1673_s27 }
 0x685   : > { %1090 = vrot.lane.b32.xlu1 %v761_v56, %s1674_s28 }
 0x6f9   : > { %v927_v5 = vpop.xlane.xlu1 %926 }
 0x6fa   : > { %v928_v6 = vsub.f32 %v924_v2, %v927_v5 }
 0x6fc   : > { %v929_v7 = vmul.f32 1.442695, %v928_v6 }
 0x6fd   : > { %v1015_v15 = vpop.permute.xlu1 %1014 }
 0x6fe   : > { %1650 = vpow2.f32 %v929_v7 }
 0x701   : > { %v1013_v17 = vpop.permute.xlu1 %1012 }
 0x705   : > { %v1091_v22 = vpop.permute.xlu1 %1090 }
 0x708   : > { %v1651_v8 = vpop.eup %1650 }
 0x709   : > { %v931_v9 = vsel %vm769_vm3, %v1651_v8, 0.0 }
 0x70a   : > { %932 = vadd.xlane.f32.xlu0 %v931_v9 }
 0x720   : > { %936 = vrot.lane.b32.xlu0 %v1809_v36, %s1670_s20 }
 0x724   : > { %1092 = vrot.lane.b32.xlu0 %v751_v52, %s1674_s28 }
 0x797   : > { %v933_v11 = vpop.xlane.xlu0 %932 }
 0x798   : > { %1652 = vrcp.f32 %v933_v11 }
 0x79b   : > { %v937_v12 = vpop.permute.xlu0 %936 }
 0x79c   : > { %1569 = vmatpush3.msra.mxu1 %v937_v12 }
 0x79d   : > { %1573 = vmatprep.subr.mxu1 %v1668_v13 }
 0x79f   : > { %v1093_v18 = vpop.permute.xlu0 %1092 }
 0x7a2   : > { %v1653_v14 = vpop.eup %1652 }
 0x7a3   : > { %v935_v16 = vmul.f32 %v1653_v14, %v1651_v8 }
 0x7a5   : > { %1571 = vmatmul.mubr.msk.f32.vlgmr.msra.gmra.mrb[6].mxu1 %vm769_vm3, %v935_v16 }
 0x7a6   : > { %1574 = vmatpush3.xpose.msk.msra.mxu1 %vm769_vm3, %v1015_v15  ;;  %1575 = vmatprep.mubr.msk.f32.mxu1 %vm1667_vm1, %v1668_v13 }
 0x7a7   : > { %1578 = vmatprep.subr.mxu1 %v1668_v13 }
 0x7a9   : > { %1576 = vmatmul.mubr.msk.f32.vlgmr.msra.gmra.mrb[8].mxu1 %vm769_vm3, %v1013_v17 }
 0x7aa   : > { %1579 = vmatpush3.xpose.msk.msra.mxu1 %vm769_vm3, %v1093_v18  ;;  %1580 = vmatprep.mubr.msk.f32.mxu1 %vm1667_vm1, %v1668_v13 }
 0x7ab   : > { %1623 = vmatprep.subr.bf16.mxu1 %v1666_v10 }
 0x7b1   : > { %1581 = vmatmul.mubr.msk.f32.vlgmr.msra.gmra.mrb[8].mxu1 %vm769_vm3, %v1091_v22 }
 0x7b2   : > { %1625 = vmatpush3.bf16.msra.mxu1 %v1624_v21  ;;  %1599 = vmatprep.mubr.msk.f32.mxu1 %vm1667_vm1, %v1668_v13 }
 0x878   : > { %v1008_v23 = vpop.f32.mrb[6].mxu1 }
 0x879   : > { %v1572_v24 = vpop.f32.mrb[7].mxu1  ;;  %1600 = vmatmul.mubr.msk.f32.vlgmr.msra.gmra.mrb[10].mxu1 %vm431_vm2, %v1008_v23 }
 0x884   : > { %v1164_v25 = vpop.f32.mrb[8].mxu1 }
 0x885   : > { %v1168_v26 = vsel %vm756_vm4, %v1164_v25, -inf  ;;  %v1582_v27 = vpop.f32.mrb[9].mxu1 }
 0x886   : > { %v1169_v28 = vsel %vm769_vm3, %v1168_v26, -inf }
 0x887   : > { %1170 = vmax.xlane.f32.xlu0 %v1169_v28 }
 0x89d   : > { %1180 = vrot.lane.b32.xlu0 %v1809_v36, %s1675_s15  ;;  %v759_v36 = vld [vmem:[%s1888_s5 + $0x10] sm:$0xff] }
 0x89e   : > { %v1621_v41 = vpack.c.bf16 %v760_v39, %v759_v36 }
 0x914   : > { %v1171_v29 = vpop.xlane.xlu0 %1170 }
 0x915   : > { %v1172_v30 = vsub.f32 %v1168_v26, %v1171_v29 }
 0x917   : > { %v1173_v31 = vmul.f32 1.442695, %v1172_v30 }
 0x918   : > { %v1181_v32 = vpop.permute.xlu0 %1180 }
 0x919   : > { %1654 = vpow2.f32 %v1173_v31  ;;  %1584 = vmatpush3.msra.mxu0 %v1181_v32 }
 0x91a   : > { %1620 = vmatprep.subr.bf16.mxu0 %v1666_v10 }
 0x923   : > { %v1655_v33 = vpop.eup %1654 }
 0x924   : > { %v1175_v34 = vsel %vm769_vm3, %v1655_v33, 0.0 }
 0x925   : > { %1176 = vadd.xlane.f32.xlu1 %v1175_v34 }
 0x94c   : > { %v1398_v35 = vpop.f32.mrb[10].mxu1 }
 0x94d   : > { %v1601_v37 = vpop.f32.mrb[11].mxu1 }
 0x9b2   : > { %v1177_v38 = vpop.xlane.xlu1 %1176 }
 0x9b3   : > { %1656 = vrcp.f32 %v1177_v38 }
 0x9bd   : > { %v1657_v40 = vpop.eup %1656 }
 0x9be   : > { %v1179_v10 = vmul.f32 %v1657_v40, %v1655_v33 }
 0x9c0   : > { %1586 = vmatmul.mubr.msk.f32.vlgmr.msra.gmra.mrb[6].mxu0 %vm769_vm3, %v1179_v10 }
 0x9c1   : > { %1622 = vmatpush3.bf16.msra.mxu0 %v1621_v41  ;;  %1592 = vmatprep.mubr.msk.f32.mxu0 %vm1667_vm1, %v1668_v13 }
 0xa93   : > { %v1252_v42 = vpop.f32.mrb[6].mxu0 }
 0xa94   : > { %v1587_v43 = vpop.f32.mrb[7].mxu0  ;;  %1593 = vmatmul.mubr.msk.f32.vlgmr.msra.gmra.mrb[8].mxu0 %vm431_vm2, %v1252_v42 }
 0xb67   : > { %v1325_v44 = vpop.f32.mrb[8].mxu0 }
 0xb68   : > { %v1399_v45 = vadd.f32 %v1398_v35, %v1325_v44  ;;  %v1594_v46 = vpop.f32.mrb[9].mxu0 }
 0xb6a   : > { %v1402_v47 = vadd.f32 %v1399_v45, %v1742_v0 }
 0xb6c   : > { %1403 = vst.msk [vmem:[%s327_s22] sm:$0xff] %vm330_vm0, %v1402_v47 }
 0xb6d PF: > { %s19_s30 = sadd.s32 1, %s1664_s30  }
 0xb6e   : > { %p16_p4 = scmp.ge.s32.totalorder %s19_s30, 4  }
 0xb70   :  { %18 = sbr.rel (!%p16_p4) target bundleno = 1 (0x1), region = 86 }

// kernel: deepseek_forward.6
= control target key start
LH: loop header
LB: loop body
LE: loop exit
PB: predicated region body
PF: predicated region fallthrough
CT: control target
= control target key end

     0   :  { %s2107_s13 = smov 0   ;;  %s2475_s0 = inlined_call_operand.vmem [shape: f32[16,32], index: 0, kind: input, shape index: {}]   ;;  %s2476_s1 = inlined_call_operand.vmem [shape: f32[1,32], index: 1, kind: input, shape index: {}]   ;;  %s2477_s2 = inlined_call_operand.vmem [shape: f32[1,32,64], index: 2, kind: input, shape index: {}]   ;;  %s2478_s3 = inlined_call_operand.vmem [shape: f32[1,32,64], index: 3, kind: input, shape index: {}]   ;;  %s2479_s4 = inlined_call_operand.vmem [shape: f32[1,64,32], index: 4, kind: input, shape index: {}]   ;;  %s2480_s5 = inlined_call_operand.vmem [shape: f32[3,32,64], index: 5, kind: input, shape index: {}]   ;;  %s2481_s6 = inlined_call_operand.vmem [shape: f32[3,32,64], index: 6, kind: input, shape index: {}]   ;;  %s2482_s7 = inlined_call_operand.vmem [shape: f32[3,64,32], index: 7, kind: input, shape index: {}]   ;;  %s2483_s8 = inlined_call_operand.vmem [shape: f32[32,3], index: 8, kind: input, shape index: {}]   ;;  %s2484_s9 = inlined_call_operand.vmem [shape: f32[1,3], index: 9, kind: input, shape index: {}]   ;;  %s2485_s10 = inlined_call_operand.vmem [shape: f32[16,32], index: 10, kind: output, shape index: {}]  }
   0x1 LB: > { %s1568_s14 = sadd.s32 4294967295, %s2041_s13   ;;  %p1572_p0 = scmp.ge.s32.totalorder %s2041_s13, 1  ;;  %s2041_s13 = sphi %s2107_s13, %s20_s13  }
   0x2   : > { %p311_p1 = scmp.lt.s32.totalorder %s2041_s13, 3 }
   0x4   : > { %p312_p2 = pnand %p1572_p0, %p311_p1 }
   0x5   : > { %p347_p3 = scmp.lt.s32.totalorder (!%p312_p2), %s1568_s14, 1  ;;  %vm357_vm0 = vcmask (!%p312_p2), 261120   ;;  %v383_v7 = vld [vmem:[%s2478_s3] sm:$0xff] (!%p312_p2)  ;;  %v384_v8 = vld [vmem:[%s2478_s3 + $0x8] sm:$0xff] (!%p312_p2)  ;;  %v2043_v12 = vmov (!%p312_p2), 0.0|0.0   ;;  %v385_v14 = vld [vmem:[%s2478_s3 + $0x10] sm:$0xff] (!%p312_p2) }
   0x6   : > { %315 = sbr.rel (%p312_p2) target bundleno = 1196 (0x4ac), region = 60  ;;  %v1896_v9 = vpack.c.bf16 (!%p312_p2), %v384_v8, %v383_v7  ;;  %v379_v10 = vld [vmem:[%s2477_s2] sm:$0xff] (!%p312_p2)  ;;  %v380_v11 = vld [vmem:[%s2477_s2 + $0x8] sm:$0xff] (!%p312_p2)  ;;  %1895 = vmatprep.subr.bf16.mxu1 (!%p312_p2), %v2043_v12  ;;  %1889 = vmatprep.subr.bf16.mxu0 (!%p312_p2), %v2043_v12  ;;  %v386_v15 = vld [vmem:[%s2478_s3 + $0x18] sm:$0xff] (!%p312_p2)  ;;  %vm2044_vm1 = vmmov (!%p312_p2), 0   ;;  %v2045_v20 = vmov (!%p312_p2), 0.0  }
   0x7   : > { %v1890_v13 = vpack.c.bf16 (!%p312_p2), %v380_v11, %v379_v10  ;;  %v1899_v16 = vpack.c.bf16 (!%p312_p2), %v386_v15, %v385_v14  ;;  %v381_v17 = vld [vmem:[%s2477_s2 + $0x10] sm:$0xff] (!%p312_p2)  ;;  %v382_v18 = vld [vmem:[%s2477_s2 + $0x18] sm:$0xff] (!%p312_p2)  ;;  %1722 = vmatprep.mubr.msk.f32.mxu0 (!%p312_p2), %vm2044_vm1, %v2045_v20  ;;  %1733 = vmatprep.mubr.msk.f32.mxu1 (!%p312_p2), %vm2044_vm1, %v2045_v20  ;;  %v620_v24 = vld [vmem:[%s2483_s8] sm:$0xff] (!%p312_p2)  ;;  %vm546_vm2 = vcmask (!%p312_p2), 523264   ;;  %s2046_s23 = smov (!%p312_p2), 2   ;;  %s2047_s24 = smov (!%p312_p2), 1  }
   0x8   : > { %1897 = vmatpush3.bf16.msra.mxu1 (!%p312_p2), %v1896_v9  ;;  %v1893_v19 = vpack.c.bf16 (!%p312_p2), %v382_v18, %v381_v17  ;;  %v621_v25 = vld [vmem:[%s2483_s8 + $0x8] sm:$0xff] (!%p312_p2)  ;;  %v1575_v27 = vld [vmem:[%s2476_s1] ss:$0 sm:$0xff] (!%p312_p2)  ;;  %v622_v31 = vld [vmem:[%s2483_s8 + $0x10] sm:$0xff] (!%p312_p2)  ;;  %s2048_s29 = smov (!%p312_p2), 127   ;;  %s2049_s17 = smov (!%p312_p2), 126  }
   0x9   : > { %1891 = vmatpush3.bf16.msra.mxu0 (!%p312_p2), %v1890_v13  ;;  %1898 = vmatprep.subr.bf16.mxu1 (!%p312_p2), %v2043_v12  ;;  %v1914_v29 = vpack.c.bf16 (!%p312_p2), %v621_v25, %v620_v24  ;;  %v623_v32 = vld [vmem:[%s2483_s8 + $0x18] sm:$0xff] (!%p312_p2)  ;;  %v770_v34 = vld [vmem:[%s2480_s5] sm:$0xff] (!%p312_p2)  ;;  %v771_v35 = vld [vmem:[%s2480_s5 + $0x8] sm:$0xff] (!%p312_p2) }
   0xa   : > { %1892 = vmatprep.subr.bf16.mxu0 (!%p312_p2), %v2043_v12  ;;  %v1917_v33 = vpack.c.bf16 (!%p312_p2), %v623_v32, %v622_v31  ;;  %v1920_v36 = vpack.c.bf16 (!%p312_p2), %v771_v35, %v770_v34  ;;  %v772_v37 = vld [vmem:[%s2480_s5 + $0x10] sm:$0xff] (!%p312_p2)  ;;  %v773_v38 = vld [vmem:[%s2480_s5 + $0x18] sm:$0xff] (!%p312_p2)  ;;  %v387_v40 = vld [vmem:[%s2479_s4] sm:$0xff] (!%p312_p2) }
   0xb   : > { %v1923_v39 = vpack.c.bf16 (!%p312_p2), %v773_v38, %v772_v37  ;;  %v388_v41 = vld [vmem:[%s2479_s4 + $0x8] sm:$0xff] (!%p312_p2)  ;;  %v389_v43 = vld [vmem:[%s2479_s4 + $0x10] sm:$0xff] (!%p312_p2)  ;;  %v390_v44 = vld [vmem:[%s2479_s4 + $0x18] sm:$0xff] (!%p312_p2) }
   0xc   : > { %1900 = vmatpush3.bf16.msra.mxu1 (!%p312_p2), %v1899_v16  ;;  %v1902_v42 = vpack.c.bf16 (!%p312_p2), %v388_v41, %v387_v40  ;;  %v1905_v45 = vpack.c.bf16 (!%p312_p2), %v390_v44, %v389_v43  ;;  %v391_v46 = vld [vmem:[%s2479_s4 + $0x20] sm:$0xff] (!%p312_p2)  ;;  %v392_v47 = vld [vmem:[%s2479_s4 + $0x28] sm:$0xff] (!%p312_p2)  ;;  %v393_v49 = vld [vmem:[%s2479_s4 + $0x30] sm:$0xff] (!%p312_p2) }
   0xd   : > { %s2487_s14 = smov (!%p347_p3, %s1568_s14), 1  ;;  %1894 = vmatpush3.bf16.msra.mxu0 %v1893_v19  ;;  %1913 = vmatprep.subr.bf16.mxu1 %v2043_v12  ;;  %v1908_v48 = vpack.c.bf16 %v392_v47, %v391_v46  ;;  %v394_v50 = vld [vmem:[%s2479_s4 + $0x38] sm:$0xff]  ;;  %v1580_v57 = vld [vmem:[%s2484_s9] ss:$0 sm:$0xff]  ;;  %v776_v11 = vld [vmem:[%s2481_s6 + $0x10] sm:$0xff] }
   0xe   : > { %s1573_s15 = sshll.u32 %s2487_s14, 3  ;;  %1901 = vmatprep.subr.bf16.mxu0 %v2043_v12  ;;  %v1911_v51 = vpack.c.bf16 %v394_v50, %v393_v49  ;;  %v777_v13 = vld [vmem:[%s2481_s6 + $0x18] sm:$0xff]  ;;  %v1591_v15 = vld [vmem:[%s2480_s5 + $0x20] sm:$0xff]  ;;  %v1592_v16 = vld [vmem:[%s2480_s5 + $0x28] sm:$0xff] }
   0xf   : > { %s350_s18 = scalar_lea.vmem %s2475_s0, %s1573_s15  ;;  %v1929_v14 = vpack.c.bf16 %v777_v13, %v776_v11  ;;  %v778_v17 = vld [vmem:[%s2482_s7] sm:$0xff]  ;;  %v779_v18 = vld [vmem:[%s2482_s7 + $0x8] sm:$0xff]  ;;  %v1944_v24 = vpack.c.bf16 %v1592_v16, %v1591_v15  ;;  %v1593_v25 = vld [vmem:[%s2480_s5 + $0x30] sm:$0xff]  ;;  %s354_s19 = scalar_lea.vmem %s2485_s10, %s1573_s15 }
  0x10   : > { %v2123_v0 = vld [vmem:[%s350_s18] sm:$0xff]  ;;  %v1932_v19 = vpack.c.bf16 %v779_v18, %v778_v17  ;;  %v1596_v31 = vld [vmem:[%s2481_s6 + $0x28] sm:$0xff]  ;;  %v1598_v34 = vld [vmem:[%s2481_s6 + $0x38] sm:$0xff] }
  0x11   : > { %v358_v1 = vsel %vm357_vm0, %v2123_v0, 0.0  ;;  %v1612_v37 = vld [vmem:[%s2480_s5 + $0x48] sm:$0xff]  ;;  %v1614_v40 = vld [vmem:[%s2480_s5 + $0x58] sm:$0xff] }
  0x12   : > { %359 = vadd.xlane.f32.xlu0 %v358_v1  ;;  %v1616_v43 = vld [vmem:[%s2481_s6 + $0x48] sm:$0xff]  ;;  %v1618_v46 = vld [vmem:[%s2481_s6 + $0x58] sm:$0xff] }
  0x13   : > { %v783_v49 = vld [vmem:[%s2482_s7 + $0x28] sm:$0xff]  ;;  %v1602_v11 = vld [vmem:[%s2482_s7 + $0x58] sm:$0xff] }
  0x9f   : > { %v360_v2 = vpop.xlane.xlu0 %359 }
  0xa0   : > { %v362_v3 = vmul.f32 0.03125, %v360_v2 }
  0xa2   : > { %v363_v4 = vsub.f32 %v2123_v0, %v362_v3 }
  0xa4   : > { %v364_v5 = vmul.f32 %v363_v4, %v363_v4 }
  0xa6   : > { %v365_v6 = vsel %vm357_vm0, %v364_v5, 0.0  ;;  %v774_v5 = vld [vmem:[%s2481_s6] sm:$0xff] }
  0xa7   : > { %366 = vadd.xlane.f32.xlu0 %v365_v6  ;;  %v775_v6 = vld [vmem:[%s2481_s6 + $0x8] sm:$0xff] }
  0xa8   : > { %v1926_v9 = vpack.c.bf16 %v775_v6, %v774_v5 }
 0x134   : > { %v367_v21 = vpop.xlane.xlu0 %366 }
 0x135   : > { %v368_v22 = vmul.f32 0.03125, %v367_v21  ;;  %v780_v21 = vld [vmem:[%s2482_s7 + $0x10] sm:$0xff] }
 0x137   : > { %v369_v23 = vadd.f32 1e-05, %v368_v22  ;;  %v781_v22 = vld [vmem:[%s2482_s7 + $0x18] sm:$0xff] }
 0x139   : > { %2011 = vrsqrt.f32 %v369_v23 }
 0x143   : > { %v2012_v26 = vpop.eup %2011 }
 0x144   : > { %v371_v28 = vmul.f32 %v2012_v26, %v363_v4  ;;  %v1594_v26 = vld [vmem:[%s2480_s5 + $0x38] sm:$0xff] }
 0x146   : > { %v2172_v30 = vmul.f32 %v1575_v27, %v371_v28  ;;  %v1935_v27 = vpack.c.bf16 %v781_v22, %v780_v21  ;;  %v1947_v28 = vpack.c.bf16 %v1594_v26, %v1593_v25  ;;  %v1606_v21 = vld [vmem:[%s2482_s7 + $0x78] sm:$0xff] }
 0x148   : > { %1723 = vmatmul.mubr.msk.f32.vlgmr.msra.gmra.mrb[0].mxu0 %vm357_vm0, %v2172_v30  ;;  %1734 = vmatmul.mubr.msk.f32.vlgmr.msra.gmra.mrb[0].mxu1 %vm357_vm0, %v2172_v30 }
 0x149   : > { %1915 = vmatpush3.bf16.msra.mxu1 %v1914_v29  ;;  %1763 = vmatprep.mubr.msk.f32.mxu1 %vm2044_vm1, %v2045_v20  ;;  %v1595_v29 = vld [vmem:[%s2481_s6 + $0x20] sm:$0xff] }
 0x14a   : > { %1916 = vmatprep.subr.bf16.mxu1 %v2043_v12  ;;  %1752 = vmatprep.mubr.msk.f32.mxu0 %vm2044_vm1, %v2045_v20  ;;  %v1950_v32 = vpack.c.bf16 %v1596_v31, %v1595_v29 }
 0x14b   : > { %1903 = vmatpush3.bf16.msra.mxu0 %v1902_v42  ;;  %v1615_v42 = vld [vmem:[%s2481_s6 + $0x40] sm:$0xff] }
 0x14c   : > { %1904 = vmatprep.subr.bf16.mxu0 %v2043_v12  ;;  %v1974_v44 = vpack.c.bf16 %v1616_v43, %v1615_v42  ;;  %v1619_v42 = vld [vmem:[%s2482_s7 + $0x80] sm:$0xff]  ;;  %v1620_v43 = vld [vmem:[%s2482_s7 + $0x88] sm:$0xff] }
 0x14d   : > { %1918 = vmatpush3.bf16.msra.mxu1 %v1917_v33  ;;  %v1597_v33 = vld [vmem:[%s2481_s6 + $0x30] sm:$0xff] }
 0x14e   : > { %1919 = vmatprep.subr.bf16.mxu1 %v2043_v12  ;;  %v1953_v35 = vpack.c.bf16 %v1598_v34, %v1597_v33 }
 0x14f   : > { %1906 = vmatpush3.bf16.msra.mxu0 %v1905_v45  ;;  %v1617_v45 = vld [vmem:[%s2481_s6 + $0x50] sm:$0xff] }
 0x150   : > { %1764 = vmatmul.mubr.msk.f32.vlgmr.msra.gmra.mrb[2].mxu1 %vm357_vm0, %v2172_v30  ;;  %1907 = vmatprep.subr.bf16.mxu0 %v2043_v12  ;;  %v1977_v47 = vpack.c.bf16 %v1618_v46, %v1617_v45  ;;  %v1980_v46 = vpack.c.bf16 %v1620_v43, %v1619_v42 }
 0x151   : > { %1921 = vmatpush3.bf16.msra.mxu1 %v1920_v36  ;;  %1774 = vmatprep.mubr.msk.f32.mxu1 %vm2044_vm1, %v2045_v20  ;;  %v1611_v36 = vld [vmem:[%s2480_s5 + $0x40] sm:$0xff] }
 0x152   : > { %1922 = vmatprep.subr.bf16.mxu1 %v2043_v12  ;;  %v1968_v38 = vpack.c.bf16 %v1612_v37, %v1611_v36 }
 0x153   : > { %1909 = vmatpush3.bf16.msra.mxu0 %v1908_v48  ;;  %v782_v48 = vld [vmem:[%s2482_s7 + $0x20] sm:$0xff] }
 0x154   : > { %1910 = vmatprep.subr.bf16.mxu0 %v2043_v12  ;;  %v1938_v50 = vpack.c.bf16 %v783_v49, %v782_v48  ;;  %v1621_v49 = vld [vmem:[%s2482_s7 + $0x90] sm:$0xff] }
 0x155   : > { %1924 = vmatpush3.bf16.msra.mxu1 %v1923_v39  ;;  %v1613_v39 = vld [vmem:[%s2480_s5 + $0x50] sm:$0xff] }
 0x156   : > { %1931 = vmatprep.subr.bf16.mxu1 %v2043_v12  ;;  %v1971_v41 = vpack.c.bf16 %v1614_v40, %v1613_v39 }
 0x157   : > { %1912 = vmatpush3.bf16.msra.mxu0 %v1911_v51  ;;  %v784_v51 = vld [vmem:[%s2482_s7 + $0x30] sm:$0xff] }
 0x158   : > { %1775 = vmatmul.mubr.msk.f32.vlgmr.msra.gmra.mrb[4].mxu1 %vm357_vm0, %v2172_v30  ;;  %1925 = vmatprep.subr.bf16.mxu0 %v2043_v12 }
 0x159   : > { %1804 = vmatprep.mubr.msk.f32.mxu1 %vm2044_vm1, %v2045_v20  ;;  %1933 = vmatpush3.bf16.msra.mxu1 %v1932_v19  ;;  %v1605_v19 = vld [vmem:[%s2482_s7 + $0x70] sm:$0xff] }
 0x15a   : > { %1934 = vmatprep.subr.bf16.mxu1 %v2043_v12  ;;  %v1965_v22 = vpack.c.bf16 %v1606_v21, %v1605_v19 }
 0x15d   : > { %1936 = vmatpush3.bf16.msra.mxu1 %v1935_v27 }
 0x15e   : > { %1937 = vmatprep.subr.bf16.mxu1 %v2043_v12 }
 0x161   : > { %1939 = vmatpush3.bf16.msra.mxu1 %v1938_v50  ;;  %v1622_v50 = vld [vmem:[%s2482_s7 + $0x98] sm:$0xff] }
 0x162   : > { %1940 = vmatprep.subr.bf16.mxu1 %v2043_v12 }
 0x21b   : > { %v464_v52 = vpop.f32.mrb[0].mxu0  ;;  %v534_v53 = vpop.f32.mrb[0].mxu1 }
 0x21c   : > { %v1578_v54 = vmul.f32 -1.442695, %v464_v52  ;;  %v1724_v55 = vpop.f32.mrb[1].mxu0  ;;  %v1735_v56 = vpop.f32.mrb[1].mxu1 }
 0x21e   : > { %2013 = vpow2.f32 %v1578_v54 }
 0x223   : > { %v697_v58 = vpop.f32.mrb[2].mxu1 }
 0x224   : > { %v698_v59 = vadd.f32 %v1580_v57, %v697_v58  ;;  %v1765_v60 = vpop.f32.mrb[3].mxu1 }
 0x226   : > { %v1582_v61 = vmul.f32 -1.442695, %v698_v59 }
 0x228   : > { %v2014_v62 = vpop.eup %2013  ;;  %2015 = vpow2.f32 %v1582_v61 }
 0x229   : > { %v541_v63 = vadd.f32 1.0, %v2014_v62 }
 0x22b   : > { %2017 = vrcp.f32 %v541_v63  ;;  %v2243_v1 = vpop.f32.mrb[4].mxu1 }
 0x22c   : > { %v1776_v2 = vpop.f32.mrb[5].mxu1  ;;  %v1589_v59 = vmul.f32 -1.442695, %v2243_v1 }
 0x232   : > { %v2016_v3 = vpop.eup %2015 }
 0x233   : > { %v704_v4 = vadd.f32 1.0, %v2016_v3  ;;  %v1599_v3 = vld [vmem:[%s2482_s7 + $0x40] sm:$0xff] }
 0x235   : > { %v2018_v7 = vpop.eup %2017  ;;  %2019 = vrcp.f32 %v704_v4  ;;  %v1600_v4 = vld [vmem:[%s2482_s7 + $0x48] sm:$0xff] }
 0x236   : > { %v544_v8 = vmul.f32 %v2018_v7, %v464_v52  ;;  %2021 = vpow2.f32 %v1589_v59  ;;  %v1956_v7 = vpack.c.bf16 %v1600_v4, %v1599_v3 }
 0x238   : > { %v545_v10 = vmul.f32 %v544_v8, %v534_v53 }
 0x23a   : > { %1753 = vmatmul.mubr.msk.f32.vlgmr.msra.gmra.mrb[2].mxu0 %vm546_vm2, %v545_v10  ;;  %v1601_v10 = vld [vmem:[%s2482_s7 + $0x50] sm:$0xff] }
 0x23b   : > { %1927 = vmatpush3.bf16.msra.mxu0 %v1926_v9  ;;  %1785 = vmatprep.mubr.msk.f32.mxu0 %vm2044_vm1, %v2045_v20  ;;  %v1959_v13 = vpack.c.bf16 %v1602_v11, %v1601_v10 }
 0x23c   : > { %1928 = vmatprep.subr.bf16.mxu0 %v2043_v12 }
 0x23f   : > { %v2279_v23 = vpop.eup %2019  ;;  %1930 = vmatpush3.bf16.msra.mxu0 %v1929_v14  ;;  %v1604_v14 = vld [vmem:[%s2482_s7 + $0x68] sm:$0xff] }
 0x240   : > { %715 = vrot.lane.b32.xlu0 %v2279_v23, %s2046_s23  ;;  %708 = vrot.lane.b32.xlu1 %v2279_v23, %s2047_s24  ;;  %v2022_v60 = vpop.eup %2021 }
 0x241   : > { %1943 = vmatprep.subr.bf16.mxu0 %v2043_v12  ;;  %v929_v61 = vadd.f32 1.0, %v2022_v60 }
 0x242   : > { %1786 = vmatmul.mubr.msk.f32.vlgmr.msra.gmra.mrb[4].mxu0 %vm357_vm0, %v2172_v30 }
 0x243   : > { %1945 = vmatpush3.bf16.msra.mxu0 %v1944_v24  ;;  %1815 = vmatprep.mubr.msk.f32.mxu0 %vm2044_vm1, %v2045_v20  ;;  %2023 = vrcp.f32 %v929_v61 }
 0x244   : > { %728 = vrot.lane.b32.xlu1 %v2279_v23, %s2048_s29  ;;  %1946 = vmatprep.subr.bf16.mxu0 %v2043_v12 }
 0x247   : > { %1948 = vmatpush3.bf16.msra.mxu0 %v1947_v28 }
 0x248   : > { %742 = vrot.lane.b32.xlu1 %v2279_v23, %s2049_s17  ;;  %1949 = vmatprep.subr.bf16.mxu0 %v2043_v12 }
 0x24a   : > { %1816 = vmatmul.mubr.msk.f32.vlgmr.msra.gmra.mrb[6].mxu0 %vm357_vm0, %v2172_v30 }
 0x24b   : > { %1951 = vmatpush3.bf16.msra.mxu0 %v1950_v32  ;;  %1826 = vmatprep.mubr.msk.f32.mxu0 %vm2044_vm1, %v2045_v20 }
 0x24c   : > { %1952 = vmatprep.subr.bf16.mxu0 %v2043_v12 }
 0x24d   : > { %v2024_v2 = vpop.eup %2023 }
 0x24e   : > { %v932_v5 = vmul.f32 %v2024_v2, %v2243_v1  ;;  %v1603_v1 = vld [vmem:[%s2482_s7 + $0x60] sm:$0xff] }
 0x24f   : > { %1954 = vmatpush3.bf16.msra.mxu0 %v1953_v35  ;;  %v1962_v16 = vpack.c.bf16 %v1604_v14, %v1603_v1 }
 0x250   : > { %1967 = vmatprep.subr.bf16.mxu0 %v2043_v12 }
 0x252   : > { %1827 = vmatmul.mubr.msk.f32.vlgmr.msra.gmra.mrb[8].mxu0 %vm357_vm0, %v2172_v30 }
 0x253   : > { %1969 = vmatpush3.bf16.msra.mxu0 %v1968_v38  ;;  %1856 = vmatprep.mubr.msk.f32.mxu0 %vm2044_vm1, %v2045_v20 }
 0x254   : > { %1970 = vmatprep.subr.bf16.mxu0 %v2043_v12 }
 0x257   : > { %1972 = vmatpush3.bf16.msra.mxu0 %v1971_v41 }
 0x258   : > { %1973 = vmatprep.subr.bf16.mxu0 %v2043_v12 }
 0x25a   : > { %1857 = vmatmul.mubr.msk.f32.vlgmr.msra.gmra.mrb[10].mxu0 %vm357_vm0, %v2172_v30 }
 0x25b   : > { %1975 = vmatpush3.bf16.msra.mxu0 %v1974_v44  ;;  %1867 = vmatprep.mubr.msk.f32.mxu0 %vm2044_vm1, %v2045_v20 }
 0x25c   : > { %1976 = vmatprep.subr.bf16.mxu0 %v2043_v12 }
 0x25f   : > { %1978 = vmatpush3.bf16.msra.mxu0 %v1977_v47 }
 0x262   : > { %1868 = vmatmul.mubr.msk.f32.vlgmr.msra.gmra.mrb[12].mxu0 %vm357_vm0, %v2172_v30  ;;  %v785_v30 = vld [vmem:[%s2482_s7 + $0x38] sm:$0xff] }
 0x263   : > { %v1941_v52 = vpack.c.bf16 %v785_v30, %v784_v51  ;;  %v1983_v30 = vpack.c.bf16 %v1622_v50, %v1621_v49 }
 0x265   : > { %1942 = vmatpush3.bf16.msra.mxu1 %v1941_v52  ;;  %v1623_v52 = vld [vmem:[%s2482_s7 + $0xa0] sm:$0xff] }
 0x266   : > { %1955 = vmatprep.subr.bf16.mxu1 %v2043_v12 }
 0x2b2   : > { %v2372_v53 = vpop.permute.xlu1 %708  ;;  %v716_v55 = vpop.permute.xlu0 %715 }
 0x2b3   : > { %vm711_vm3 = vcmp.gt.f32.partialorder %v2279_v23, %v2372_v53  ;;  %vm718_vm5 = vcmp.gt.f32.partialorder %v2279_v23, %v716_v55  ;;  %v1624_v55 = vld [vmem:[%s2482_s7 + $0xa8] sm:$0xff] }
 0x2b4   : > { %v2377_v54 = vsel %vm711_vm3, 1.0, %v2045_v20  ;;  %v1584_v58 = vsel %vm718_vm5, 1.0, %v2045_v20 }
 0x2b5   : > { %736 = vrot.lane.b32.xlu1 %v2377_v54, %s2049_s17 }
 0x2b6   : > { %v729_v56 = vpop.permute.xlu1 %728 }
 0x2b7   : > { %vm731_vm4 = vcmp.ge.f32.partialorder %v2279_v23, %v729_v56 }
 0x2b8   : > { %v1585_v57 = vsel %vm731_vm4, 1.0, %v2045_v20 }
 0x2b9   : > { %750 = vrot.lane.b32.xlu1 %v1585_v57, %s2048_s29 }
 0x2ba   : > { %v743_v24 = vpop.permute.xlu1 %742 }
 0x2bb   : > { %vm745_vm6 = vcmp.ge.f32.partialorder %v2279_v23, %v743_v24  ;;  %v2050_v23 = vmov 1  }
 0x2bc   : > { %v1586_v32 = vsel %vm745_vm6, 1.0, %v2045_v20  ;;  %2008 = vset.pattern.permute.xlu1 %v2050_v23 }
 0x2bd   : > { %722 = vrot.lane.b32.xlu1 %v1584_v58, %s2048_s29 }
 0x30d   : > { %v2388_v62 = vpop.f32.mrb[2].mxu0 }
 0x30e   : > { %v1754_v63 = vpop.f32.mrb[3].mxu0 }
 0x315   : > { %v922_v6 = vpop.f32.mrb[4].mxu0 }
 0x316   : > { %v933_v8 = vmul.f32 %v932_v5, %v922_v6  ;;  %v1787_v9 = vpop.f32.mrb[5].mxu0 }
 0x318   : > { %1805 = vmatmul.mubr.msk.f32.vlgmr.msra.gmra.mrb[6].mxu1 %vm546_vm2, %v933_v8  ;;  %v2051_v8 = vmov 0  }
 0x319   : > { %1957 = vmatpush3.bf16.msra.mxu1 %v1956_v7  ;;  %1845 = vmatprep.mubr.msk.f32.mxu1 %vm2044_vm1, %v2045_v20 }
 0x31a   : > { %1958 = vmatprep.subr.bf16.mxu1 %v2043_v12  ;;  %2009 = vset.pattern.permute.xlu0 %v2051_v8 }
 0x31d   : > { %v1104_v15 = vpop.f32.mrb[6].mxu0  ;;  %1960 = vmatpush3.bf16.msra.mxu1 %v1959_v13 }
 0x31e   : > { %v1609_v17 = vmul.f32 -1.442695, %v1104_v15  ;;  %v1817_v18 = vpop.f32.mrb[7].mxu0  ;;  %1961 = vmatprep.subr.bf16.mxu1 %v2043_v12 }
 0x31f   : > { %v768_v18 = vadd.f32 %v2388_v62, %v2123_v0 }
 0x320   : > { %2025 = vpow2.f32 %v1609_v17 }
 0x321   : > { %1963 = vmatpush3.bf16.msra.mxu1 %v1962_v16 }
 0x322   : > { %1964 = vmatprep.subr.bf16.mxu1 %v2043_v12 }
 0x325   : > { %v1174_v25 = vpop.f32.mrb[8].mxu0  ;;  %1966 = vmatpush3.bf16.msra.mxu1 %v1965_v22 }
 0x326   : > { %v1828_v26 = vpop.f32.mrb[9].mxu0  ;;  %1979 = vmatprep.subr.bf16.mxu1 %v2043_v12 }
 0x327   : > { %v737_v27 = vpop.permute.xlu1 %736 }
 0x328   : > { %v739_v28 = vadd.f32 %v1585_v57, %v737_v27  ;;  %v1625_v57 = vld [vmem:[%s2482_s7 + $0xb0] sm:$0xff] }
 0x32a   : > { %v2026_v29 = vpop.eup %2025  ;;  %vm740_vm7 = vcmp.lt.f32.partialorder %v739_v28, 2.0 }
 0x32b   : > { %v1181_v31 = vadd.f32 1.0, %v2026_v29  ;;  %v751_v33 = vpop.permute.xlu1 %750  ;;  %v2424_v34 = vsel %vm740_vm7, %v729_v56, 0.0  ;;  %v1986_v56 = vpack.c.bf16 %v1624_v55, %v1623_v52 }
 0x32c   : > { %v753_v35 = vadd.f32 %v1586_v32, %v751_v33  ;;  %757 = vrot.lane.b32.xlu1 %v2424_v34, %s2047_s24 }
 0x32d   : > { %2027 = vrcp.f32 %v1181_v31  ;;  %v1352_v36 = vpop.f32.mrb[10].mxu0 }
 0x32e   : > { %vm754_vm8 = vcmp.lt.f32.partialorder %v753_v35, 2.0  ;;  %v1629_v37 = vmul.f32 -1.442695, %v1352_v36  ;;  %v1858_v38 = vpop.f32.mrb[11].mxu0 }
 0x32f   : > { %v755_v39 = vsel %vm754_vm8, %v743_v24, 0.0  ;;  %v723_v63 = vpop.permute.xlu1 %722 }
 0x330   : > { %2029 = vpow2.f32 %v1629_v37  ;;  %762 = vrot.lane.b32.xlu1 %v755_v39, %s2047_s24  ;;  %v725_v2 = vadd.f32 %v2377_v54, %v723_v63 }
 0x332   : > { %vm726_vm9 = vcmp.lt.f32.partialorder %v725_v2, 2.0 }
 0x333   : > { %v727_v4 = vsel %vm726_vm9, %v2372_v53, 0.0 }
 0x335   : > { %v1422_v40 = vpop.f32.mrb[12].mxu0 }
 0x336   : > { %v1869_v41 = vpop.f32.mrb[13].mxu0 }
 0x337   : > { %v2028_v44 = vpop.eup %2027 }
 0x338   : > { %v1184_v45 = vmul.f32 %v2028_v44, %v1104_v15 }
 0x33a   : > { %v2030_v47 = vpop.eup %2029  ;;  %v1185_v48 = vmul.f32 %v1184_v45, %v1174_v25 }
 0x33b   : > { %v1429_v51 = vadd.f32 1.0, %v2030_v47 }
 0x33c   : > { %1846 = vmatmul.mubr.msk.f32.vlgmr.msra.gmra.mrb[8].mxu1 %vm546_vm2, %v1185_v48 }
 0x33d   : > { %2031 = vrcp.f32 %v1429_v51  ;;  %1981 = vmatpush3.bf16.msra.mxu1 %v1980_v46  ;;  %1886 = vmatprep.mubr.msk.f32.mxu1 %vm2044_vm1, %v2045_v20  ;;  %v1626_v20 = vld [vmem:[%s2482_s7 + $0xb8] sm:$0xff] }
 0x33e   : > { %1982 = vmatprep.subr.bf16.mxu1 %v2043_v12  ;;  %v1989_v58 = vpack.c.bf16 %v1626_v20, %v1625_v57 }
 0x341   : > { %1984 = vmatpush3.bf16.msra.mxu1 %v1983_v30 }
 0x342   : > { %1985 = vmatprep.subr.bf16.mxu1 %v2043_v12 }
 0x345   : > { %1987 = vmatpush3.bf16.msra.mxu1 %v1986_v56 }
 0x346   : > { %1988 = vmatprep.subr.bf16.mxu1 %v2043_v12 }
 0x347   : > { %v2032_v59 = vpop.eup %2031 }
 0x348   : > { %v1432_v60 = vmul.f32 %v2032_v59, %v1352_v36 }
 0x349   : > { %1990 = vmatpush3.bf16.msra.mxu1 %v1989_v58 }
 0x34a   : > { %v1433_v61 = vmul.f32 %v1432_v60, %v1422_v40 }
 0x34c   : > { %1887 = vmatmul.mubr.msk.f32.vlgmr.msra.gmra.mrb[10].mxu1 %vm546_vm2, %v1433_v61 }
 0x39e   : > { %v758_v3 = vpop.permute.xlu1 %757 }
 0x39f   : > { %v760_v5 = vadd.f32 %v758_v3, %v727_v4 }
 0x3a2   : > { %v763_v6 = vpop.permute.xlu1 %762 }
 0x3a3   : > { %v765_v7 = vadd.f32 %v763_v6, %v760_v5 }
 0x3a5   : > { %2033 = vrcp.f32 %v765_v7 }
 0x3af   : > { %v2034_v12 = vpop.eup %2033 }
 0x3b0   : > { %1015 = vrot.lane.b32.xlu0 %v2034_v12, %s2048_s29  ;;  %v769_v9 = vmul.f32 %v2034_v12, %v727_v4 }
 0x3b2   : > { %1009 = vperm.xlu1 %2008, %v769_v9  }
 0x3b6   : > { %2010 = vset.pattern.permute.xlu1 %v2051_v8 }
 0x3eb   : > { %v1003_v10 = vpop.f32.mrb[6].mxu1 }
 0x3ec   : > { %v1806_v11 = vpop.f32.mrb[7].mxu1 }
 0x40f   : > { %v1255_v13 = vpop.f32.mrb[8].mxu1 }
 0x410   : > { %v1847_v54 = vpop.f32.mrb[9].mxu1 }
 0x41f   : > { %v1503_v1 = vpop.f32.mrb[10].mxu1 }
 0x420   : > { %v1888_v14 = vpop.f32.mrb[11].mxu1 }
 0x422   : > { %v1016_v53 = vpop.permute.xlu0 %1015 }
 0x423   : > { %v1018_v15 = vmul.f32 %v1016_v53, %v2424_v34  ;;  %v1266_v16 = vmul.f32 %v1016_v53, %v755_v39 }
 0x425   : > { %1261 = vperm.xlu0 %2009, %v1018_v15   ;;  %1509 = vperm.xlu1 %2010, %v1266_v16  }
 0x431   : > { %v1010_v17 = vpop.permute.xlu1 %1009 }
 0x432   : > { %v1012_v19 = vmul.f32 %v1010_v17, %v1003_v10 }
 0x434   : > { %v1013_v21 = vadd.f32 %v1012_v19, %v768_v18 }
 0x4a4   : > { %v1262_v22 = vpop.permute.xlu0 %1261  ;;  %v1510_v24 = vpop.permute.xlu1 %1509 }
 0x4a5   : > { %v1264_v25 = vmul.f32 %v1262_v22, %v1255_v13  ;;  %v1512_v27 = vmul.f32 %v1510_v24, %v1503_v1 }
 0x4a7   : > { %v1265_v26 = vadd.f32 %v1264_v25, %v1013_v21 }
 0x4a9   : > { %v1513_v28 = vadd.f32 %v1512_v27, %v1265_v26 }
 0x4ab   : > { %1514 = vst.msk [vmem:[%s354_s19] sm:$0xff] %vm357_vm0, %v1513_v28 }
 0x4ac PF: > { %s20_s13 = sadd.s32 1, %s2041_s13  }
 0x4ad   : > { %p17_p4 = scmp.ge.s32.totalorder %s20_s13, 4  }
 0x4af   :  { %19 = sbr.rel (!%p17_p4) target bundleno = 1 (0x1), region = 96 }

</bundles_post_ra>
